<compile_context>
chip_gen: v5e
topology: v5e:2x2
jax: 0.10.0
libtpu: 0.0.40
codegen_flags: <defaults>
</compile_context>

<pallas_src>
import functools

import jax
import jax.numpy as jnp
from jax import lax
from jax.experimental import pallas as pl
from jax.experimental.pallas import tpu as pltpu


def encoder_kernel(emb_ref, w_e2h_ref, b_e2h_ref, wa_ref, ba_ref, wg_ref, bg_ref,
                   w_h2e_ref, b_h2e_ref, out_ref, xp_ref, *,
                   n_layers, kernel_size, in_off):
    """One batch-tile of the forward pass (post-embedding-gather)."""
    TB, S, E = emb_ref.shape
    H = w_e2h_ref.shape[1]
    E_pad = w_h2e_ref.shape[1]
    pad = (kernel_size - 1) // 2
    rows = TB * S
    scale = jnp.sqrt(jnp.float32(0.5))            # matches torch sqrt(0.5) residual scale

    # emb2hid: flat (rows, E) @ (E, H) on the MXU, bf16 operands, f32 accumulate.
    x = emb_ref[...].reshape(rows, E)                                   # bf16
    h = jnp.dot(x, w_e2h_ref[...], preferred_element_type=jnp.float32)
    h = h + b_e2h_ref[...]                                              # (rows, H) f32

    # Padded conv-input scratch: zero once per grid step; the halo rows are never
    # written again, the interior is fully overwritten every layer.
    xp_ref[...] = jnp.zeros_like(xp_ref)

    conv = h                                                            # (rows, H) f32
    for l in range(n_layers):                      # static, tiny layer count
        # interior store at an 8-aligned sublane offset (in_off == 8)
        xp_ref[:, pl.ds(in_off, S), :] = conv.reshape(TB, S, H)

        # GLU halves kept as separate lane-aligned accumulators, bias-initialized.
        acc_a = jnp.broadcast_to(ba_ref[l], (rows, H))                  # (rows, H) f32
        acc_g = jnp.broadcast_to(bg_ref[l], (rows, H))
        for j in range(kernel_size):               # conv1d as K shifted flat matmuls
            tap = xp_ref[:, pl.ds(in_off - pad + j, S), :]              # (TB, S, H)
            tap = tap.reshape(rows, H).astype(jnp.bfloat16)
            acc_a = acc_a + jnp.dot(tap, wa_ref[l, j],
                                    preferred_element_type=jnp.float32)
            acc_g = acc_g + jnp.dot(tap, wg_ref[l, j],
                                    preferred_element_type=jnp.float32)

        conved = acc_a * jax.nn.sigmoid(acc_g)     # F.glu along channels (EUP sigmoid)
        conv = (conved + conv) * scale             # residual + sqrt(0.5), f32 VPU math

    # hid2emb: output columns padded to 128 lanes -> unmasked lane-dense stores.
    out = jnp.dot(conv.astype(jnp.bfloat16), w_h2e_ref[...],
                  preferred_element_type=jnp.float32) + b_h2e_ref[...]  # (rows, E_pad)
    out_ref[...] = out.reshape(TB, S, E_pad).astype(out_ref.dtype)


def linear_encoder_cnn_nopos(src, params, *, n_layers, kernel_size, block_b=None):
    assert kernel_size % 2 == 1, "Kernel size must be odd!"
    pad = (kernel_size - 1) // 2
    IN_OFF = 8                                   # 8-aligned interior start in scratch
    assert pad <= IN_OFF

    # Embedding gather stays glue, but in bf16 (halves HBM traffic of the gather).
    emb = params['tok_embedding'].astype(jnp.bfloat16)[src]             # (B, S, E) bf16
    B, S, E = emb.shape
    H = params['w_e2h'].shape[1]
    E_PAD = ((E + 127) // 128) * 128

    # ---- wrapper-side layout plumbing (pure weight prep, done once) ----
    w_e2h = params['w_e2h'].astype(jnp.bfloat16)                        # (E, H)
    b_e2h = params['b_e2h'].reshape(1, H).astype(jnp.float32)           # (1, H)

    wc = params['w_conv']                                               # (L, K, H, 2H)
    bc = params['b_conv'].reshape(n_layers, 1, 2 * H)
    wa = wc[..., :H].astype(jnp.bfloat16)                               # (L, K, H, H)
    wg = wc[..., H:].astype(jnp.bfloat16)
    ba = bc[..., :H].astype(jnp.float32)                                # (L, 1, H)
    bg = bc[..., H:].astype(jnp.float32)

    w_h2e = jnp.zeros((H, E_PAD), jnp.bfloat16).at[:, :E].set(
        params['w_h2e'].astype(jnp.bfloat16))
    b_h2e = jnp.zeros((1, E_PAD), jnp.float32).at[:, :E].set(
        params['b_h2e'].reshape(1, E).astype(jnp.float32))

    # Batch tile: aim for a few hundred token rows per block on v5e/v6e; halve it
    # on v7x (64 MiB VMEM).  Conv padding is per sequence -> no halo across tiles.
    if block_b is None:
        block_b = max(1, min(B, 512 // S))
    TB = block_b
    B_pad = ((B + TB - 1) // TB) * TB
    if B_pad != B:
        emb = jnp.concatenate(
            [emb, jnp.zeros((B_pad - B, S, E), emb.dtype)], axis=0)

    full = lambda a: pl.BlockSpec(a.shape, lambda i: (0,) * a.ndim)     # VMEM-resident

    out = pl.pallas_call(
        functools.partial(encoder_kernel, n_layers=n_layers,
                          kernel_size=kernel_size, in_off=IN_OFF),
        out_shape=jax.ShapeDtypeStruct((B_pad, S, E_PAD), jnp.float32),
        grid=(B_pad // TB,),
        in_specs=[
            pl.BlockSpec((TB, S, E), lambda i: (i, 0, 0)),
            full(w_e2h), full(b_e2h),
            full(wa), full(ba), full(wg), full(bg),
            full(w_h2e), full(b_h2e),
        ],
        out_specs=pl.BlockSpec((TB, S, E_PAD), lambda i: (i, 0, 0)),
        scratch_shapes=[pltpu.VMEM((TB, IN_OFF + S + IN_OFF, H), jnp.float32)],
        compiler_params=pltpu.CompilerParams(
            dimension_semantics=("parallel",),
            vmem_limit_bytes=32 * 1024 * 1024),
    )(emb, w_e2h, b_e2h, wa, ba, wg, bg, w_h2e, b_h2e)

    return out[:B, :, :E]


def reference(src, params, n_layers, kernel_size):
    """Pure-JAX f32 reference (lax.conv validates the conv semantics independently)."""
    emb = params['tok_embedding'][src].astype(jnp.float32)
    h = emb @ params['w_e2h'] + params['b_e2h']
    conv_input = h
    pad = (kernel_size - 1) // 2
    scale = jnp.sqrt(jnp.float32(0.5))
    for l in range(n_layers):
        conved = lax.conv_general_dilated(
            conv_input, params['w_conv'][l],
            window_strides=(1,), padding=[(pad, pad)],
            dimension_numbers=('NWC', 'WIO', 'NWC')) + params['b_conv'][l]
        H = conv_input.shape[-1]
        conved = conved[..., :H] * jax.nn.sigmoid(conved[..., H:])
        conv_input = (conved + conv_input) * scale
    return conv_input @ params['w_h2e'] + params['b_h2e']


if __name__ == "__main__":
    # Module hyper-params (small, consistent with the PyTorch module).
    input_dim   = 23     # vocab size
    emb_dim     = 32
    hid_dim     = 64
    n_layers    = 2
    kernel_size = 3      # must be odd
    B, S        = 4, 16  # small, gives a 2-step batch grid with block_b=2

    key = jax.random.PRNGKey(0)
    keys = jax.random.split(key, 8)
    params = {
        # nn.Embedding(input_dim, emb_dim)
        'tok_embedding': jax.random.normal(keys[0], (input_dim, emb_dim), jnp.float32),
        # nn.Linear(emb_dim, hid_dim): stored as (in, out) so y = x @ W + b
        'w_e2h': 0.1 * jax.random.normal(keys[1], (emb_dim, hid_dim), jnp.float32),
        'b_e2h': 0.1 * jax.random.normal(keys[2], (1, hid_dim), jnp.float32),
        # n_layers x Conv1d(hid, 2*hid, K): PyTorch weight (2H, H, K) permuted to (K, H, 2H)
        'w_conv': 0.1 * jax.random.normal(
            keys[3], (n_layers, kernel_size, hid_dim, 2 * hid_dim), jnp.float32),
        'b_conv': 0.1 * jax.random.normal(keys[4], (n_layers, 1, 2 * hid_dim), jnp.float32),
        # nn.Linear(hid_dim, emb_dim)
        'w_h2e': 0.1 * jax.random.normal(keys[5], (hid_dim, emb_dim), jnp.float32),
        'b_h2e': 0.1 * jax.random.normal(keys[6], (1, emb_dim), jnp.float32),
    }
    src = jax.random.randint(keys[7], (B, S), 0, input_dim)

    out = linear_encoder_cnn_nopos(src, params, n_layers=n_layers,
                                   kernel_size=kernel_size, block_b=2)
    out = jax.block_until_ready(out)

    ref = reference(src, params, n_layers, kernel_size)
    assert out.shape == (B, S, emb_dim), out.shape
    # bf16 MXU operands (f32 accumulate) -> looser tolerance than the pure-f32 check.
    err = float(jnp.max(jnp.abs(out - ref)))
    assert err < 5e-2, f"max abs err {err}"

    print("KERNEL_OK")
</pallas_src>

<mosaic_0001>
module attributes {stable_mosaic.version = 11 : i64} {
  func.func @encoder_kernel(%arg0: i32, %arg1: memref<2x16x32xbf16, #tpu.memory_space<vmem>>, %arg2: memref<32x64xbf16, #tpu.memory_space<vmem>>, %arg3: memref<1x64xf32, #tpu.memory_space<vmem>>, %arg4: memref<2x3x64x64xbf16, #tpu.memory_space<vmem>>, %arg5: memref<2x1x64xf32, #tpu.memory_space<vmem>>, %arg6: memref<2x3x64x64xbf16, #tpu.memory_space<vmem>>, %arg7: memref<2x1x64xf32, #tpu.memory_space<vmem>>, %arg8: memref<64x128xbf16, #tpu.memory_space<vmem>>, %arg9: memref<1x128xf32, #tpu.memory_space<vmem>>, %arg10: memref<2x16x128xf32, #tpu.memory_space<vmem>>, %arg11: memref<2x32x64xf32, #tpu.memory_space<vmem>>) attributes {dimension_semantics = [#tpu.dimension_semantics<parallel>], iteration_bounds = array<i64: 2>, scalar_prefetch = 0 : i64, scratch_operands = 1 : i64, tpu.core_type = #tpu.core_type<tc>, window_params = [{transform_indices = @transform_0, window_bounds = array<i64: 2, 16, 32>}, {pipeline_mode = #tpu.pipeline_mode<synchronous>, transform_indices = @transform_1, window_bounds = array<i64: 32, 64>}, {pipeline_mode = #tpu.pipeline_mode<synchronous>, transform_indices = @transform_2, window_bounds = array<i64: 1, 64>}, {pipeline_mode = #tpu.pipeline_mode<synchronous>, transform_indices = @transform_3, window_bounds = array<i64: 2, 3, 64, 64>}, {pipeline_mode = #tpu.pipeline_mode<synchronous>, transform_indices = @transform_4, window_bounds = array<i64: 2, 1, 64>}, {pipeline_mode = #tpu.pipeline_mode<synchronous>, transform_indices = @transform_5, window_bounds = array<i64: 2, 3, 64, 64>}, {pipeline_mode = #tpu.pipeline_mode<synchronous>, transform_indices = @transform_6, window_bounds = array<i64: 2, 1, 64>}, {pipeline_mode = #tpu.pipeline_mode<synchronous>, transform_indices = @transform_7, window_bounds = array<i64: 64, 128>}, {pipeline_mode = #tpu.pipeline_mode<synchronous>, transform_indices = @transform_8, window_bounds = array<i64: 1, 128>}, {transform_indices = @transform_9, window_bounds = array<i64: 2, 16, 128>}]} {
    %cst = arith.constant 5.000000e-01 : f32
    %0 = math.sqrt %cst : f32
    %c0 = arith.constant 0 : index
    %c0_0 = arith.constant 0 : index
    %c0_1 = arith.constant 0 : index
    %1 = vector.load %arg1[%c0, %c0_0, %c0_1] : memref<2x16x32xbf16, #tpu.memory_space<vmem>>, vector<2x16x32xbf16>
    %2 = vector.shape_cast %1 : vector<2x16x32xbf16> to vector<32x32xbf16>
    %c0_2 = arith.constant 0 : index
    %c0_3 = arith.constant 0 : index
    %3 = vector.load %arg2[%c0_2, %c0_3] : memref<32x64xbf16, #tpu.memory_space<vmem>>, vector<32x64xbf16>
    %cst_4 = arith.constant dense<0.000000e+00> : vector<32x64xf32>
    %4 = tpu.matmul %2, %3, %cst_4 {dimension_numbers = #tpu.dot_dimension_numbers<[1], [0], [0], [1], [0, 0, 1, 1], [], []>} : vector<32x32xbf16>, vector<32x64xbf16>, vector<32x64xf32> -> vector<32x64xf32>
    %c0_5 = arith.constant 0 : index
    %c0_6 = arith.constant 0 : index
    %5 = vector.load %arg3[%c0_5, %c0_6] : memref<1x64xf32, #tpu.memory_space<vmem>>, vector<1x64xf32>
    %6 = vector.broadcast %5 : vector<1x64xf32> to vector<32x64xf32>
    %7 = arith.addf %4, %6 : vector<32x64xf32>
    %cst_7 = arith.constant 0.000000e+00 : f32
    %8 = vector.broadcast %cst_7 : f32 to vector<2x32x64xf32>
    %c0_8 = arith.constant 0 : index
    %c0_9 = arith.constant 0 : index
    %c0_10 = arith.constant 0 : index
    %9 = vector.load %arg11[%c0_8, %c0_9, %c0_10] : memref<2x32x64xf32, #tpu.memory_space<vmem>>, vector<2x32x64xf32>
    tpu.vector_store %arg11[%c0_8, %c0_9, %c0_10], %8 {strides = array<i32>} : memref<2x32x64xf32, #tpu.memory_space<vmem>>, vector<2x32x64xf32>,
    %10 = vector.shape_cast %7 : vector<32x64xf32> to vector<2x16x64xf32>
    %c0_11 = arith.constant 0 : index
    %c8 = arith.constant 8 : index
    %c0_12 = arith.constant 0 : index
    %11 = vector.load %arg11[%c0_11, %c8, %c0_12] : memref<2x32x64xf32, #tpu.memory_space<vmem>>, vector<2x16x64xf32>
    tpu.vector_store %arg11[%c0_11, %c8, %c0_12], %10 {strides = array<i32>} : memref<2x32x64xf32, #tpu.memory_space<vmem>>, vector<2x16x64xf32>,
    %c0_13 = arith.constant 0 : index
    %c0_14 = arith.constant 0 : index
    %c0_15 = arith.constant 0 : index
    %12 = vector.load %arg5[%c0_13, %c0_14, %c0_15] : memref<2x1x64xf32, #tpu.memory_space<vmem>>, vector<1x1x64xf32>
    %13 = vector.shape_cast %12 : vector<1x1x64xf32> to vector<1x64xf32>
    %14 = vector.shape_cast %13 : vector<1x64xf32> to vector<1x64xf32>
    %15 = vector.broadcast %14 : vector<1x64xf32> to vector<32x64xf32>
    %c0_16 = arith.constant 0 : index
    %c0_17 = arith.constant 0 : index
    %c0_18 = arith.constant 0 : index
    %16 = vector.load %arg7[%c0_16, %c0_17, %c0_18] : memref<2x1x64xf32, #tpu.memory_space<vmem>>, vector<1x1x64xf32>
    %17 = vector.shape_cast %16 : vector<1x1x64xf32> to vector<1x64xf32>
    %18 = vector.shape_cast %17 : vector<1x64xf32> to vector<1x64xf32>
    %19 = vector.broadcast %18 : vector<1x64xf32> to vector<32x64xf32>
    %c0_19 = arith.constant 0 : index
    %c7 = arith.constant 7 : index
    %c0_20 = arith.constant 0 : index
    %20 = vector.load %arg11[%c0_19, %c7, %c0_20] : memref<2x32x64xf32, #tpu.memory_space<vmem>>, vector<2x16x64xf32>
    %21 = vector.shape_cast %20 : vector<2x16x64xf32> to vector<32x64xf32>
    %22 = arith.truncf %21 : vector<32x64xf32> to vector<32x64xbf16>
    %c0_21 = arith.constant 0 : index
    %c0_22 = arith.constant 0 : index
    %c0_23 = arith.constant 0 : index
    %c0_24 = arith.constant 0 : index
    %23 = vector.load %arg4[%c0_21, %c0_22, %c0_23, %c0_24] : memref<2x3x64x64xbf16, #tpu.memory_space<vmem>>, vector<1x1x64x64xbf16>
    %24 = vector.shape_cast %23 : vector<1x1x64x64xbf16> to vector<64x64xbf16>
    %cst_25 = arith.constant dense<0.000000e+00> : vector<32x64xf32>
    %25 = tpu.matmul %22, %24, %cst_25 {dimension_numbers = #tpu.dot_dimension_numbers<[1], [0], [0], [1], [0, 0, 1, 1], [], []>} : vector<32x64xbf16>, vector<64x64xbf16>, vector<32x64xf32> -> vector<32x64xf32>
    %26 = arith.addf %15, %25 : vector<32x64xf32>
    %c0_26 = arith.constant 0 : index
    %c0_27 = arith.constant 0 : index
    %c0_28 = arith.constant 0 : index
    %c0_29 = arith.constant 0 : index
    %27 = vector.load %arg6[%c0_26, %c0_27, %c0_28, %c0_29] : memref<2x3x64x64xbf16, #tpu.memory_space<vmem>>, vector<1x1x64x64xbf16>
    %28 = vector.shape_cast %27 : vector<1x1x64x64xbf16> to vector<64x64xbf16>
    %cst_30 = arith.constant dense<0.000000e+00> : vector<32x64xf32>
    %29 = tpu.matmul %22, %28, %cst_30 {dimension_numbers = #tpu.dot_dimension_numbers<[1], [0], [0], [1], [0, 0, 1, 1], [], []>} : vector<32x64xbf16>, vector<64x64xbf16>, vector<32x64xf32> -> vector<32x64xf32>
    %30 = arith.addf %19, %29 : vector<32x64xf32>
    %c0_31 = arith.constant 0 : index
    %c8_32 = arith.constant 8 : index
    %c0_33 = arith.constant 0 : index
    %31 = vector.load %arg11[%c0_31, %c8_32, %c0_33] : memref<2x32x64xf32, #tpu.memory_space<vmem>>, vector<2x16x64xf32>
    %32 = vector.shape_cast %31 : vector<2x16x64xf32> to vector<32x64xf32>
    %33 = arith.truncf %32 : vector<32x64xf32> to vector<32x64xbf16>
    %c0_34 = arith.constant 0 : index
    %c1 = arith.constant 1 : index
    %c0_35 = arith.constant 0 : index
    %c0_36 = arith.constant 0 : index
    %34 = vector.load %arg4[%c0_34, %c1, %c0_35, %c0_36] : memref<2x3x64x64xbf16, #tpu.memory_space<vmem>>, vector<1x1x64x64xbf16>
    %35 = vector.shape_cast %34 : vector<1x1x64x64xbf16> to vector<64x64xbf16>
    %cst_37 = arith.constant dense<0.000000e+00> : vector<32x64xf32>
    %36 = tpu.matmul %33, %35, %cst_37 {dimension_numbers = #tpu.dot_dimension_numbers<[1], [0], [0], [1], [0, 0, 1, 1], [], []>} : vector<32x64xbf16>, vector<64x64xbf16>, vector<32x64xf32> -> vector<32x64xf32>
    %37 = arith.addf %26, %36 : vector<32x64xf32>
    %c0_38 = arith.constant 0 : index
    %c1_39 = arith.constant 1 : index
    %c0_40 = arith.constant 0 : index
    %c0_41 = arith.constant 0 : index
    %38 = vector.load %arg6[%c0_38, %c1_39, %c0_40, %c0_41] : memref<2x3x64x64xbf16, #tpu.memory_space<vmem>>, vector<1x1x64x64xbf16>
    %39 = vector.shape_cast %38 : vector<1x1x64x64xbf16> to vector<64x64xbf16>
    %cst_42 = arith.constant dense<0.000000e+00> : vector<32x64xf32>
    %40 = tpu.matmul %33, %39, %cst_42 {dimension_numbers = #tpu.dot_dimension_numbers<[1], [0], [0], [1], [0, 0, 1, 1], [], []>} : vector<32x64xbf16>, vector<64x64xbf16>, vector<32x64xf32> -> vector<32x64xf32>
    %41 = arith.addf %30, %40 : vector<32x64xf32>
    %c0_43 = arith.constant 0 : index
    %c9 = arith.constant 9 : index
    %c0_44 = arith.constant 0 : index
    %42 = vector.load %arg11[%c0_43, %c9, %c0_44] : memref<2x32x64xf32, #tpu.memory_space<vmem>>, vector<2x16x64xf32>
    %43 = vector.shape_cast %42 : vector<2x16x64xf32> to vector<32x64xf32>
    %44 = arith.truncf %43 : vector<32x64xf32> to vector<32x64xbf16>
    %c0_45 = arith.constant 0 : index
    %c2 = arith.constant 2 : index
    %c0_46 = arith.constant 0 : index
    %c0_47 = arith.constant 0 : index
    %45 = vector.load %arg4[%c0_45, %c2, %c0_46, %c0_47] : memref<2x3x64x64xbf16, #tpu.memory_space<vmem>>, vector<1x1x64x64xbf16>
    %46 = vector.shape_cast %45 : vector<1x1x64x64xbf16> to vector<64x64xbf16>
    %cst_48 = arith.constant dense<0.000000e+00> : vector<32x64xf32>
    %47 = tpu.matmul %44, %46, %cst_48 {dimension_numbers = #tpu.dot_dimension_numbers<[1], [0], [0], [1], [0, 0, 1, 1], [], []>} : vector<32x64xbf16>, vector<64x64xbf16>, vector<32x64xf32> -> vector<32x64xf32>
    %48 = arith.addf %37, %47 : vector<32x64xf32>
    %c0_49 = arith.constant 0 : index
    %c2_50 = arith.constant 2 : index
    %c0_51 = arith.constant 0 : index
    %c0_52 = arith.constant 0 : index
    %49 = vector.load %arg6[%c0_49, %c2_50, %c0_51, %c0_52] : memref<2x3x64x64xbf16, #tpu.memory_space<vmem>>, vector<1x1x64x64xbf16>
    %50 = vector.shape_cast %49 : vector<1x1x64x64xbf16> to vector<64x64xbf16>
    %cst_53 = arith.constant dense<0.000000e+00> : vector<32x64xf32>
    %51 = tpu.matmul %44, %50, %cst_53 {dimension_numbers = #tpu.dot_dimension_numbers<[1], [0], [0], [1], [0, 0, 1, 1], [], []>} : vector<32x64xbf16>, vector<64x64xbf16>, vector<32x64xf32> -> vector<32x64xf32>
    %52 = arith.addf %41, %51 : vector<32x64xf32>
    %53 = arith.negf %52 : vector<32x64xf32>
    %54 = math.exp %53 : vector<32x64xf32>
    %cst_54 = arith.constant 1.000000e+00 : f32
    %55 = vector.broadcast %cst_54 : f32 to vector<32x64xf32>
    %56 = arith.addf %55, %54 : vector<32x64xf32>
    %57 = arith.divf %55, %56 : vector<32x64xf32>
    %58 = arith.mulf %48, %57 : vector<32x64xf32>
    %59 = arith.addf %58, %7 : vector<32x64xf32>
    %60 = vector.broadcast %0 : f32 to vector<32x64xf32>
    %61 = arith.mulf %59, %60 : vector<32x64xf32>
    %62 = vector.shape_cast %61 : vector<32x64xf32> to vector<2x16x64xf32>
    %c0_55 = arith.constant 0 : index
    %c8_56 = arith.constant 8 : index
    %c0_57 = arith.constant 0 : index
    %63 = vector.load %arg11[%c0_55, %c8_56, %c0_57] : memref<2x32x64xf32, #tpu.memory_space<vmem>>, vector<2x16x64xf32>
    tpu.vector_store %arg11[%c0_55, %c8_56, %c0_57], %62 {strides = array<i32>} : memref<2x32x64xf32, #tpu.memory_space<vmem>>, vector<2x16x64xf32>,
    %c1_58 = arith.constant 1 : index
    %c0_59 = arith.constant 0 : index
    %c0_60 = arith.constant 0 : index
    %64 = vector.load %arg5[%c1_58, %c0_59, %c0_60] : memref<2x1x64xf32, #tpu.memory_space<vmem>>, vector<1x1x64xf32>
    %65 = vector.shape_cast %64 : vector<1x1x64xf32> to vector<1x64xf32>
    %66 = vector.shape_cast %65 : vector<1x64xf32> to vector<1x64xf32>
    %67 = vector.broadcast %66 : vector<1x64xf32> to vector<32x64xf32>
    %c1_61 = arith.constant 1 : index
    %c0_62 = arith.constant 0 : index
    %c0_63 = arith.constant 0 : index
    %68 = vector.load %arg7[%c1_61, %c0_62, %c0_63] : memref<2x1x64xf32, #tpu.memory_space<vmem>>, vector<1x1x64xf32>
    %69 = vector.shape_cast %68 : vector<1x1x64xf32> to vector<1x64xf32>
    %70 = vector.shape_cast %69 : vector<1x64xf32> to vector<1x64xf32>
    %71 = vector.broadcast %70 : vector<1x64xf32> to vector<32x64xf32>
    %c0_64 = arith.constant 0 : index
    %c7_65 = arith.constant 7 : index
    %c0_66 = arith.constant 0 : index
    %72 = vector.load %arg11[%c0_64, %c7_65, %c0_66] : memref<2x32x64xf32, #tpu.memory_space<vmem>>, vector<2x16x64xf32>
    %73 = vector.shape_cast %72 : vector<2x16x64xf32> to vector<32x64xf32>
    %74 = arith.truncf %73 : vector<32x64xf32> to vector<32x64xbf16>
    %c1_67 = arith.constant 1 : index
    %c0_68 = arith.constant 0 : index
    %c0_69 = arith.constant 0 : index
    %c0_70 = arith.constant 0 : index
    %75 = vector.load %arg4[%c1_67, %c0_68, %c0_69, %c0_70] : memref<2x3x64x64xbf16, #tpu.memory_space<vmem>>, vector<1x1x64x64xbf16>
    %76 = vector.shape_cast %75 : vector<1x1x64x64xbf16> to vector<64x64xbf16>
    %cst_71 = arith.constant dense<0.000000e+00> : vector<32x64xf32>
    %77 = tpu.matmul %74, %76, %cst_71 {dimension_numbers = #tpu.dot_dimension_numbers<[1], [0], [0], [1], [0, 0, 1, 1], [], []>} : vector<32x64xbf16>, vector<64x64xbf16>, vector<32x64xf32> -> vector<32x64xf32>
    %78 = arith.addf %67, %77 : vector<32x64xf32>
    %c1_72 = arith.constant 1 : index
    %c0_73 = arith.constant 0 : index
    %c0_74 = arith.constant 0 : index
    %c0_75 = arith.constant 0 : index
    %79 = vector.load %arg6[%c1_72, %c0_73, %c0_74, %c0_75] : memref<2x3x64x64xbf16, #tpu.memory_space<vmem>>, vector<1x1x64x64xbf16>
    %80 = vector.shape_cast %79 : vector<1x1x64x64xbf16> to vector<64x64xbf16>
    %cst_76 = arith.constant dense<0.000000e+00> : vector<32x64xf32>
    %81 = tpu.matmul %74, %80, %cst_76 {dimension_numbers = #tpu.dot_dimension_numbers<[1], [0], [0], [1], [0, 0, 1, 1], [], []>} : vector<32x64xbf16>, vector<64x64xbf16>, vector<32x64xf32> -> vector<32x64xf32>
    %82 = arith.addf %71, %81 : vector<32x64xf32>
    %c0_77 = arith.constant 0 : index
    %c8_78 = arith.constant 8 : index
    %c0_79 = arith.constant 0 : index
    %83 = vector.load %arg11[%c0_77, %c8_78, %c0_79] : memref<2x32x64xf32, #tpu.memory_space<vmem>>, vector<2x16x64xf32>
    %84 = vector.shape_cast %83 : vector<2x16x64xf32> to vector<32x64xf32>
    %85 = arith.truncf %84 : vector<32x64xf32> to vector<32x64xbf16>
    %c1_80 = arith.constant 1 : index
    %c1_81 = arith.constant 1 : index
    %c0_82 = arith.constant 0 : index
    %c0_83 = arith.constant 0 : index
    %86 = vector.load %arg4[%c1_80, %c1_81, %c0_82, %c0_83] : memref<2x3x64x64xbf16, #tpu.memory_space<vmem>>, vector<1x1x64x64xbf16>
    %87 = vector.shape_cast %86 : vector<1x1x64x64xbf16> to vector<64x64xbf16>
    %cst_84 = arith.constant dense<0.000000e+00> : vector<32x64xf32>
    %88 = tpu.matmul %85, %87, %cst_84 {dimension_numbers = #tpu.dot_dimension_numbers<[1], [0], [0], [1], [0, 0, 1, 1], [], []>} : vector<32x64xbf16>, vector<64x64xbf16>, vector<32x64xf32> -> vector<32x64xf32>
    %89 = arith.addf %78, %88 : vector<32x64xf32>
    %c1_85 = arith.constant 1 : index
    %c1_86 = arith.constant 1 : index
    %c0_87 = arith.constant 0 : index
    %c0_88 = arith.constant 0 : index
    %90 = vector.load %arg6[%c1_85, %c1_86, %c0_87, %c0_88] : memref<2x3x64x64xbf16, #tpu.memory_space<vmem>>, vector<1x1x64x64xbf16>
    %91 = vector.shape_cast %90 : vector<1x1x64x64xbf16> to vector<64x64xbf16>
    %cst_89 = arith.constant dense<0.000000e+00> : vector<32x64xf32>
    %92 = tpu.matmul %85, %91, %cst_89 {dimension_numbers = #tpu.dot_dimension_numbers<[1], [0], [0], [1], [0, 0, 1, 1], [], []>} : vector<32x64xbf16>, vector<64x64xbf16>, vector<32x64xf32> -> vector<32x64xf32>
    %93 = arith.addf %82, %92 : vector<32x64xf32>
    %c0_90 = arith.constant 0 : index
    %c9_91 = arith.constant 9 : index
    %c0_92 = arith.constant 0 : index
    %94 = vector.load %arg11[%c0_90, %c9_91, %c0_92] : memref<2x32x64xf32, #tpu.memory_space<vmem>>, vector<2x16x64xf32>
    %95 = vector.shape_cast %94 : vector<2x16x64xf32> to vector<32x64xf32>
    %96 = arith.truncf %95 : vector<32x64xf32> to vector<32x64xbf16>
    %c1_93 = arith.constant 1 : index
    %c2_94 = arith.constant 2 : index
    %c0_95 = arith.constant 0 : index
    %c0_96 = arith.constant 0 : index
    %97 = vector.load %arg4[%c1_93, %c2_94, %c0_95, %c0_96] : memref<2x3x64x64xbf16, #tpu.memory_space<vmem>>, vector<1x1x64x64xbf16>
    %98 = vector.shape_cast %97 : vector<1x1x64x64xbf16> to vector<64x64xbf16>
    %cst_97 = arith.constant dense<0.000000e+00> : vector<32x64xf32>
    %99 = tpu.matmul %96, %98, %cst_97 {dimension_numbers = #tpu.dot_dimension_numbers<[1], [0], [0], [1], [0, 0, 1, 1], [], []>} : vector<32x64xbf16>, vector<64x64xbf16>, vector<32x64xf32> -> vector<32x64xf32>
    %100 = arith.addf %89, %99 : vector<32x64xf32>
    %c1_98 = arith.constant 1 : index
    %c2_99 = arith.constant 2 : index
    %c0_100 = arith.constant 0 : index
    %c0_101 = arith.constant 0 : index
    %101 = vector.load %arg6[%c1_98, %c2_99, %c0_100, %c0_101] : memref<2x3x64x64xbf16, #tpu.memory_space<vmem>>, vector<1x1x64x64xbf16>
    %102 = vector.shape_cast %101 : vector<1x1x64x64xbf16> to vector<64x64xbf16>
    %cst_102 = arith.constant dense<0.000000e+00> : vector<32x64xf32>
    %103 = tpu.matmul %96, %102, %cst_102 {dimension_numbers = #tpu.dot_dimension_numbers<[1], [0], [0], [1], [0, 0, 1, 1], [], []>} : vector<32x64xbf16>, vector<64x64xbf16>, vector<32x64xf32> -> vector<32x64xf32>
    %104 = arith.addf %93, %103 : vector<32x64xf32>
    %105 = arith.negf %104 : vector<32x64xf32>
    %106 = math.exp %105 : vector<32x64xf32>
    %cst_103 = arith.constant 1.000000e+00 : f32
    %107 = vector.broadcast %cst_103 : f32 to vector<32x64xf32>
    %108 = arith.addf %107, %106 : vector<32x64xf32>
    %109 = arith.divf %107, %108 : vector<32x64xf32>
    %110 = arith.mulf %100, %109 : vector<32x64xf32>
    %111 = arith.addf %110, %61 : vector<32x64xf32>
    %112 = vector.broadcast %0 : f32 to vector<32x64xf32>
    %113 = arith.mulf %111, %112 : vector<32x64xf32>
    %114 = arith.truncf %113 : vector<32x64xf32> to vector<32x64xbf16>
    %c0_104 = arith.constant 0 : index
    %c0_105 = arith.constant 0 : index
    %115 = vector.load %arg8[%c0_104, %c0_105] : memref<64x128xbf16, #tpu.memory_space<vmem>>, vector<64x128xbf16>
    %cst_106 = arith.constant dense<0.000000e+00> : vector<32x128xf32>
    %116 = tpu.matmul %114, %115, %cst_106 {dimension_numbers = #tpu.dot_dimension_numbers<[1], [0], [0], [1], [0, 0, 1, 1], [], []>} : vector<32x64xbf16>, vector<64x128xbf16>, vector<32x128xf32> -> vector<32x128xf32>
    %c0_107 = arith.constant 0 : index
    %c0_108 = arith.constant 0 : index
    %117 = vector.load %arg9[%c0_107, %c0_108] : memref<1x128xf32, #tpu.memory_space<vmem>>, vector<1x128xf32>
    %118 = vector.broadcast %117 : vector<1x128xf32> to vector<32x128xf32>
    %119 = arith.addf %116, %118 : vector<32x128xf32>
    %120 = vector.shape_cast %119 : vector<32x128xf32> to vector<2x16x128xf32>
    %c0_109 = arith.constant 0 : index
    %c0_110 = arith.constant 0 : index
    %c0_111 = arith.constant 0 : index
    %121 = vector.load %arg10[%c0_109, %c0_110, %c0_111] : memref<2x16x128xf32, #tpu.memory_space<vmem>>, vector<2x16x128xf32>
    tpu.vector_store %arg10[%c0_109, %c0_110, %c0_111], %120 {strides = array<i32>} : memref<2x16x128xf32, #tpu.memory_space<vmem>>, vector<2x16x128xf32>,
    return
  }
  func.func @transform_0(%arg0: i32) -> (i32, i32, i32) {
    %c0_i32 = arith.constant 0 : i32
    %c0_i32_0 = arith.constant 0 : i32
    %c0_i32_1 = arith.constant 0 : i32
    return %arg0, %c0_i32, %c0_i32_0 : i32, i32, i32
  }
  func.func @transform_1(%arg0: i32) -> (i32, i32) {
    %c0_i32 = arith.constant 0 : i32
    %c0_i32_0 = arith.constant 0 : i32
    %c0_i32_1 = arith.constant 0 : i32
    return %c0_i32, %c0_i32_0 : i32, i32
  }
  func.func @transform_2(%arg0: i32) -> (i32, i32) {
    %c0_i32 = arith.constant 0 : i32
    %c0_i32_0 = arith.constant 0 : i32
    %c0_i32_1 = arith.constant 0 : i32
    return %c0_i32, %c0_i32_0 : i32, i32
  }
  func.func @transform_3(%arg0: i32) -> (i32, i32, i32, i32) {
    %c0_i32 = arith.constant 0 : i32
    %c0_i32_0 = arith.constant 0 : i32
    %c0_i32_1 = arith.constant 0 : i32
    %c0_i32_2 = arith.constant 0 : i32
    %c0_i32_3 = arith.constant 0 : i32
    return %c0_i32, %c0_i32_0, %c0_i32_1, %c0_i32_2 : i32, i32, i32, i32
  }
  func.func @transform_4(%arg0: i32) -> (i32, i32, i32) {
    %c0_i32 = arith.constant 0 : i32
    %c0_i32_0 = arith.constant 0 : i32
    %c0_i32_1 = arith.constant 0 : i32
    %c0_i32_2 = arith.constant 0 : i32
    return %c0_i32, %c0_i32_0, %c0_i32_1 : i32, i32, i32
  }
  func.func @transform_5(%arg0: i32) -> (i32, i32, i32, i32) {
    %c0_i32 = arith.constant 0 : i32
    %c0_i32_0 = arith.constant 0 : i32
    %c0_i32_1 = arith.constant 0 : i32
    %c0_i32_2 = arith.constant 0 : i32
    %c0_i32_3 = arith.constant 0 : i32
    return %c0_i32, %c0_i32_0, %c0_i32_1, %c0_i32_2 : i32, i32, i32, i32
  }
  func.func @transform_6(%arg0: i32) -> (i32, i32, i32) {
    %c0_i32 = arith.constant 0 : i32
    %c0_i32_0 = arith.constant 0 : i32
    %c0_i32_1 = arith.constant 0 : i32
    %c0_i32_2 = arith.constant 0 : i32
    return %c0_i32, %c0_i32_0, %c0_i32_1 : i32, i32, i32
  }
  func.func @transform_7(%arg0: i32) -> (i32, i32) {
    %c0_i32 = arith.constant 0 : i32
    %c0_i32_0 = arith.constant 0 : i32
    %c0_i32_1 = arith.constant 0 : i32
    return %c0_i32, %c0_i32_0 : i32, i32
  }
  func.func @transform_8(%arg0: i32) -> (i32, i32) {
    %c0_i32 = arith.constant 0 : i32
    %c0_i32_0 = arith.constant 0 : i32
    %c0_i32_1 = arith.constant 0 : i32
    return %c0_i32, %c0_i32_0 : i32, i32
  }
  func.func @transform_9(%arg0: i32) -> (i32, i32, i32) {
    %c0_i32 = arith.constant 0 : i32
    %c0_i32_0 = arith.constant 0 : i32
    %c0_i32_1 = arith.constant 0 : i32
    return %arg0, %c0_i32, %c0_i32_0 : i32, i32, i32
  }
}

</mosaic_0001>

<bundles_post_ra>
// kernel: tpu_custom_call.1
= control target key start
LH: loop header
LB: loop body
LE: loop exit
PB: predicated region body
PF: predicated region fallthrough
CT: control target
= control target key end

     0   :  { %s2789_s0 = inlined_call_operand.hbm [shape: bf16[4,16,32], index: 0, kind: input, shape index: {}]   ;;  %s2790_s1 = inlined_call_operand.hbm [shape: bf16[32,64], index: 1, kind: input, shape index: {}]   ;;  %s2791_s2 = inlined_call_operand.hbm [shape: f32[1,64], index: 2, kind: input, shape index: {}]   ;;  %s2792_s3 = inlined_call_operand.hbm [shape: bf16[2,3,64,64], index: 3, kind: input, shape index: {}]   ;;  %s2793_s4 = inlined_call_operand.vmem [shape: f32[2,1,64], index: 4, kind: input, shape index: {}]   ;;  %s2794_s5 = inlined_call_operand.hbm [shape: bf16[2,3,64,64], index: 5, kind: input, shape index: {}]   ;;  %s2795_s6 = inlined_call_operand.vmem [shape: f32[2,1,64], index: 6, kind: input, shape index: {}]   ;;  %s2796_s7 = inlined_call_operand.hbm [shape: bf16[64,128], index: 7, kind: input, shape index: {}]   ;;  %s2797_s8 = inlined_call_operand.vmem [shape: f32[1,128], index: 8, kind: input, shape index: {}]   ;;  %s2798_s9 = inlined_call_operand.hbm [shape: f32[4,16,128], index: 9, kind: output, shape index: {}]  }
   0x1   :  { %2801 = sst [smem:[#allocation20_spill]] %s2790_s1 }
   0x2   :  { %2802 = sst [smem:[#allocation21_spill]] %s2791_s2 }
   0x3   :  { %2803 = sst [smem:[#allocation22_spill]] %s2792_s3 }
   0x4   :  { %14 = vsyncpa [#allocation4], 0 }
   0x5   :  { %16 = vsyncpa [#allocation4 + $0x1], 0 }
   0x6   :  { %17 = vsyncpa [#allocation7], 0 }
   0x7   :  { %18 = vsyncpa [#allocation10], 0 }
   0x8   :  { %19 = vsyncpa [#allocation13], 0 }
   0x9   :  { %20 = vsyncpa [#allocation5], 0 }
   0xa   :  { %22 = vsyncpa [#allocation5 + $0x1], 0  ;;  %s2470_s30 = smov 0   ;;  %s2472_s10 = smov 0  }
   0xb   :  { %s2474_s11 = smov 0   ;;  %s2476_s12 = smov 0  }
   0xc LB: > { %s2804_s1 = sld [smem:[#allocation20_spill]]  ;;  %s2494_s16 = sadd.s32 4294967295, %s2408_s12   ;;  %s2408_s12 = sphi %s2476_s12, %s2819_s12   ;;  %s2404_s11 = sphi %s2474_s11, %s2818_s11   ;;  %s2400_s10 = sphi %s2472_s10, %s2817_s10   ;;  %s2396_s30 = sphi %s2470_s30, %s2816_s30  }
   0xd   : > { %p1657_p0 = scmp.ge.s32.totalorder %s2408_s12, 1  ;;  %p49_p1 = scmp.eq.s32.totalorder %s2494_s16, 0 }
   0xe   : > { %p253_p2 = scmp.lt.s32.totalorder %s2408_s12, 3  ;;  %s2410_s18 = smov [#allocation6]  }
   0xf   : > { %s266_s19 = sshll.u32 %s2410_s18, 4  ;;  %s2806_s3 = sld [smem:[#allocation22_spill]]  ;;  %s267_s19 = int_to_ptr.vmem [resolvable:$true] %s266_s19 }
  0x10   : > { %p2499_p3 = pnand %p1657_p0, %p253_p2  ;;  %s2808_s2 = sld [smem:[#allocation21_spill]] }
  0x11   : > { %s2411_s27 = smov [#allocation9]   ;;  %s2799_s29 = smov 64  }
  0x12   : > { %s264_s15 = sshll.u32 %s2804_s1, 4  ;;  %p2034_p4 = pneg %p2499_p3  ;;  %s265_s15 = int_to_ptr.hbm [resolvable:$true] %s264_s15 }
  0x13   : > { %s292_s28 = sshll.u32 %s2411_s27, 4  ;;  %s2800_s13 = smov 4   ;;  %s293_s28 = int_to_ptr.vmem [resolvable:$true] %s292_s28 }
  0x14   : > { %p2511_p6 = pnand %p2034_p4, %p49_p1  ;;  %s307_s20 = sshll.u32 %s2794_s5, 4  ;;  %s308_s20 = int_to_ptr.hbm [resolvable:$true] %s307_s20 }
  0x15   : > { %s290_s22 = sshll.u32 %s2806_s3, 4  ;;  %s2414_s21 = smov [#allocation8]   ;;  %s291_s22 = int_to_ptr.hbm [resolvable:$true] %s290_s22 }
  0x16   : > { %s279_s26 = sshll.u32 %s2808_s2, 4  ;;  %s281_s24 = sshll.u32 %s2414_s21, 4  ;;  %s280_s26 = int_to_ptr.hbm [resolvable:$true] %s279_s26  ;;  %s282_s24 = int_to_ptr.vmem [resolvable:$true] %s281_s24 }
  0x17   : > { %2037 = dma.hbm_to_vmem [thread:$0]  (!%p2511_p6), %s265_s15, 256, %s267_s19, [#allocation7], %s2799_s29, %s2799_s29, %s2800_s13  }
  0x18   : > { %2043 = dma.hbm_to_vmem [thread:$0]  (!%p2511_p6), %s291_s22, 3072, %s293_s28, [#allocation10], %s2799_s29, %s2799_s29, %s2800_s13  }
  0x19   : > { %2040 = dma.hbm_to_vmem [thread:$0]  (!%p2511_p6), %s280_s26, 16, %s282_s24, [#allocation7]  }
  0x1a   : > { %s2415_s15 = smov [#allocation11]   ;;  %s324_s27 = sshll.u32 %s2796_s7, 4  ;;  %s325_s27 = int_to_ptr.hbm [resolvable:$true] %s324_s27 }
  0x1b   : > { %s309_s19 = sshll.u32 %s2415_s15, 4  ;;  %s2416_s26 = smov [#allocation12]   ;;  %s310_s19 = int_to_ptr.vmem [resolvable:$true] %s309_s19 }
  0x1c   : > { %2046 = dma.hbm_to_vmem [thread:$0]  (!%p2511_p6), %s308_s20, 3072, %s310_s19, [#allocation10], %s2799_s29, %s2799_s29, %s2800_s13  }
  0x1d   : > { %s326_s28 = sshll.u32 %s2416_s26, 4  ;;  %s1656_s14 = sadd.s32 4294967294, %s2408_s12   ;;  %s327_s28 = int_to_ptr.vmem [resolvable:$true] %s326_s28 }
  0x1e   : > { %2049 = dma.hbm_to_vmem [thread:$0]  (!%p2511_p6), %s325_s27, 512, %s327_s28, [#allocation13], %s2799_s29, %s2799_s29, %s2800_s13  }
  0x1f   : > { %s2548_s18 = sadd.s32 1, %s2408_s12   ;;  %s35_s21 = sadd.s32 1, %s2404_s11 }
  0x20   : > { %s32_s24 = ssub.s32 %s2408_s12, %s2548_s18  ;;  %p42_p7 = scmp.ne.s32.totalorder %s2404_s11, %s2400_s10 }
  0x21   : > { %p33_p8 = scmp.eq.s32.totalorder %s32_s24, 0  ;;  %p43_p9 = scmp.eq.s32.totalorder %s2408_s12, 0 }
  0x22   : > { %p48_p10 = scmp.ne.s32.totalorder %s2400_s10, %s2396_s30  ;;  %p240_p11 = scmp.eq.s32.totalorder %s2494_s16, 1 }
  0x23   : > { %s2560_s20 = scalar_select %p33_p8, %s2404_s11, %s35_s21  }
  0x24   : > { %p2564_p12 = por %p49_p1, %p48_p10  ;;  %p2568_p13 = por %p240_p11, %p42_p7 }
  0x25   : > { %p246_p0 = scmp.eq.s32.totalorder %s1656_s14, 1  ;;  %p44_p2 = por %p43_p9, %p42_p7 }
  0x26   : > { %s343_s19 = sand.u32 1, %s2404_s11   ;;  %p2063_p6 = scmp.lt.s32.totalorder %s2408_s12, 2 }
  0x27   : > { %p2573_p4 = por %p246_p0, %p48_p10  ;;  %s1664_s25 = sshll.u32 %s343_s19, 4 }
  0x28   : > { %s1945_s27 = sshll.u32 %s2408_s12, 4  ;;  %s347_s29 = scalar_lea.vmem [#allocation3], %s1664_s25 }
  0x29   : > { %s353_s21 = scalar_lea.hbm %s2789_s0, %s1945_s27  ;;  %s356_s13 = sshll.u32 %s347_s29, 4  ;;  %s357_s13 = int_to_ptr.vmem [resolvable:$true] %s356_s13 }
  0x2a   : > { %s354_s24 = sshll.u32 %s353_s21, 4  ;;  %p2582_p8 = pnand %p2063_p6, %p44_p2  ;;  %s355_s24 = int_to_ptr.hbm [resolvable:$true] %s354_s24 }
  0x2b   : > { %s344_s1 = scalar_lea.sflag [#allocation4], %s343_s19  ;;  %s2300_s2 = sshra.s32 %s355_s24, 4  ;;  %s2301_s2 = int_to_ptr.hbm [resolvable:$true] %s2300_s2 }
  0x2c   : > { %s2302_s3 = scalar_lea.hbm %s2301_s2, 16  ;;  %p2304_p9 = pneg %p2582_p8 }
  0x2d   : > { %p2303_p7 = scmp.ne.s32.totalorder %s2301_s2, %s2302_s3  ;;  %s2307_s29 = scalar_lea.hbm %s2789_s0, 32 }
  0x2e   : > { %p2308_p0 = scmp.lt.s32.totalorder %s2301_s2, %s2789_s0  ;;  %p2309_p2 = scmp.lt.s32.totalorder %s2307_s29, %s2302_s3 }
  0x2f   : > { %p2305_p10 = pnand %p2304_p9, %p2303_p7 }
  0x30   : > { %p2310_p6 = por %p2309_p2, %p2308_p0 }
  0x31   : > { %p2306_p11 = pneg %p2305_p10 }
  0x33   : > { %p2311_p5 = pnand %p2310_p6, %p2306_p11 }
  0x35   : > { %2314 = shalt.err (!%p2311_p5)
}
  0x36   : > { %s2813_s19 = smov 4   ;;  %s2814_s21 = smov 64  }
  0x37   : > { %2053 = dma.hbm_to_vmem [thread:$0]  (!%p2582_p8), %s355_s24, 256, %s357_s13, %s344_s1, %s2814_s21, %s2814_s21, %s2813_s19  }
  0x38   : > { %368 = sbr.rel (%p2499_p3) target bundleno = 822 (0x336), region = 56  ;;  %s2602_s27 = sand.u32 (!%p2499_p3), 1, %s2400_s10  }
  0x39   : > { %s1669_s2 = sshll.u32 (!%p2499_p3), %s2602_s27, 4  ;;  %s371_s3 = scalar_lea.sflag (!%p2499_p3), [#allocation4], %s2602_s27 }
  0x3a   : > { %s374_s26 = scalar_lea.vmem (!%p2499_p3), [#allocation3], %s1669_s2 }
  0x3d   : > { %2375 = dma.done.wait (%p2564_p12), %s371_s3, 256  }
  0x3e   : > { %2377 = vsyncadd (%p2564_p12), %s371_s3, 4294967040 }
  0x3f   : > { %2379 = dma.done.wait (%p49_p1), [#allocation7], 272  }
  0x40   : > { %2381 = vsyncadd (%p49_p1), [#allocation7], 4294967024 }
  0x41   : > { %2383 = dma.done.wait (%p49_p1), [#allocation10], 6144  }
  0x42   : > { %2385 = vsyncadd (%p49_p1), [#allocation10], 4294961152 }
  0x43   : > { %2387 = dma.done.wait (%p49_p1), [#allocation13], 512  }
  0x44   : > { %2389 = vsyncadd (%p49_p1), [#allocation13], 4294966784  ;;  %v1949_v0 = vld [vmem:[#allocation6 + $0x8] sm:$0xff]  ;;  %v1948_v1 = vld [vmem:[#allocation6] sm:$0xff]  ;;  %vm472_vm0 = vcmask 261120   ;;  %vm498_vm1 = vcmask 523264  }
  0x45   : > { %485 = vmatpush.bf16.msra.mxu0 %v1949_v0  ;;  %2004 = vmatpush.bf16.msra.mxu3 %v1949_v0  ;;  %v1946_v2 = vld [vmem:[%s374_s26] sm:$0xff]  ;;  %v1947_v3 = vld [vmem:[%s374_s26 + $0x8] sm:$0xff]  ;;  %v2417_v4 = vmov 0.0   ;;  %s1675_s28 = sshll.u32 %s2602_s27, 5  ;;  %s2003_s3 = sshll.u32 %s2494_s16, 5 }
  0x46   : > { %500 = vst.msk [vmem:[#allocation2 + $0x8] sm:$0xff] %vm498_vm1, %v2417_v4  ;;  %v1953_v5 = vld [vmem:[#allocation9 + $0x18] sm:$0xff]  ;;  %v1952_v8 = vld [vmem:[#allocation9 + $0x10] sm:$0xff]  ;;  %v1951_v11 = vld [vmem:[#allocation9 + $0x8] sm:$0xff]  ;;  %s434_s2 = scalar_lea.vmem [#allocation14], %s1675_s28  ;;  %s1531_s17 = scalar_lea.hbm %s2798_s9, %s2003_s3 }
  0x47   : > { %499 = vst.msk [vmem:[#allocation2] sm:$0xff] %vm498_vm1, %v2417_v4  ;;  %v1961_v6 = vld [vmem:[#allocation9 + $0x38] sm:$0xff]  ;;  %567 = vmatpush.bf16.msra.mxu1 %v1953_v5  ;;  %2006 = vmatpush.bf16.msra.mxu2 %v1953_v5  ;;  %v1960_v9 = vld [vmem:[#allocation9 + $0x30] sm:$0xff]  ;;  %v1959_v12 = vld [vmem:[#allocation9 + $0x28] sm:$0xff]  ;;  %s1532_s13 = sshll.u32 %s434_s2, 4  ;;  %s1534_s23 = sshll.u32 %s1531_s17, 4  ;;  %s1533_s13 = int_to_ptr.vmem [resolvable:$true] %s1532_s13  ;;  %s1535_s23 = int_to_ptr.hbm [resolvable:$true] %s1534_s23 }
  0x48   : > { %501 = vst.msk [vmem:[#allocation2 + $0x10] sm:$0xff] %vm498_vm1, %v2417_v4  ;;  %v1965_v7 = vld [vmem:[#allocation11 + $0x38] sm:$0xff]  ;;  %v1964_v10 = vld [vmem:[#allocation11 + $0x30] sm:$0xff]  ;;  %v1963_v13 = vld [vmem:[#allocation11 + $0x28] sm:$0xff]  ;;  %s1519_s24 = scalar_lea.sflag [#allocation5], %s2602_s27  ;;  %s2344_s14 = sshra.s32 %s1535_s23, 4  ;;  %s2345_s14 = int_to_ptr.hbm [resolvable:$true] %s2344_s14 }
  0x49   : > { %486 = vmatpush.bf16.msra.mxu0 %v1948_v1  ;;  %2005 = vmatpush.bf16.msra.mxu3 %v1948_v1  ;;  %502 = vst.msk [vmem:[#allocation2 + $0x18] sm:$0xff] %vm498_vm1, %v2417_v4  ;;  %v1950_v14 = vld [vmem:[#allocation9] sm:$0xff]  ;;  %v1969_v17 = vld [vmem:[#allocation9 + $0x58] sm:$0xff]  ;;  %v1968_v18 = vld [vmem:[#allocation9 + $0x50] sm:$0xff]  ;;  %s2346_s29 = scalar_lea.hbm %s2345_s14, 32  ;;  %s2350_s28 = scalar_lea.hbm %s2798_s9, 64 }
  0x4a   : > { %503 = vst.msk [vmem:[#allocation2 + $0x20] sm:$0xff] %vm498_vm1, %v2417_v4  ;;  %v1958_v15 = vld [vmem:[#allocation9 + $0x20] sm:$0xff]  ;;  %v1957_v19 = vld [vmem:[#allocation11 + $0x18] sm:$0xff]  ;;  %v1967_v20 = vld [vmem:[#allocation9 + $0x48] sm:$0xff]  ;;  %p2347_p1 = scmp.ne.s32.totalorder %s2345_s14, %s2346_s29  ;;  %p2351_p12 = scmp.lt.s32.totalorder %s2345_s14, %s2798_s9 }
  0x4b   : > { %504 = vst.msk [vmem:[#allocation2 + $0x28] sm:$0xff] %vm498_vm1, %v2417_v4  ;;  %568 = vmatpush.bf16.msra.mxu1 %v1952_v8  ;;  %2007 = vmatpush.bf16.msra.mxu2 %v1952_v8  ;;  %v1962_v16 = vld [vmem:[#allocation11 + $0x20] sm:$0xff]  ;;  %v1956_v21 = vld [vmem:[#allocation11 + $0x10] sm:$0xff]  ;;  %v2112_v22 = vld [vmem:[#allocation8] ss:$0 sm:$0xff]  ;;  %p2352_p8 = scmp.lt.s32.totalorder %s2350_s28, %s2346_s29 }
  0x4c   : > { %1692 = vmatmul.msk.bf16.vlgmr.msra.gmra.mxu0 %vm472_vm0, %v1946_v2  ;;  %1693 = vmatmul.msk.bf16.vlgmr.msra.gmra.mxu3 %vm472_vm0, %v1947_v3  ;;  %505 = vst.msk [vmem:[#allocation2 + $0x30] sm:$0xff] %vm498_vm1, %v2417_v4  ;;  %v1966_v23 = vld [vmem:[#allocation9 + $0x40] sm:$0xff]  ;;  %v1955_v26 = vld [vmem:[#allocation11 + $0x8] sm:$0xff]  ;;  %v1973_v42 = vld [vmem:[#allocation11 + $0x58] sm:$0xff]  ;;  %p2348_p3 = pnand %p2347_p1, %p2568_p13 }
  0x4d   : > { %690 = vmatpush.bf16.msrb.mxu3 %v1961_v6  ;;  %746 = vmatpush.bf16.msrb.mxu0 %v1965_v7  ;;  %506 = vst.msk [vmem:[#allocation2 + $0x38] sm:$0xff] %vm498_vm1, %v2417_v4  ;;  %v1954_v28 = vld [vmem:[#allocation11] sm:$0xff]  ;;  %v1972_v44 = vld [vmem:[#allocation11 + $0x50] sm:$0xff]  ;;  %v1971_v48 = vld [vmem:[#allocation11 + $0x48] sm:$0xff]  ;;  %p2353_p7 = por %p2352_p8, %p2351_p12 }
  0x4e   : > { %v1970_v52 = vld [vmem:[#allocation11 + $0x40] sm:$0xff]  ;;  %v2114_v61 = vld [vmem:[%s2795_s6] ss:$0 sm:$0xff]  ;;  %p2349_p5 = pneg %p2348_p3 }
  0x4f   : > { %569 = vmatpush.bf16.msra.mxu1 %v1951_v11  ;;  %2008 = vmatpush.bf16.msra.mxu2 %v1951_v11  ;;  %v1985_v11 = vld [vmem:[#allocation9 + $0x98] sm:$0xff] }
  0x50   : > { %p2354_p9 = pnand %p2353_p7, %p2349_p5 }
  0x51   : > { %691 = vmatpush.bf16.msrb.mxu3 %v1960_v9  ;;  %747 = vmatpush.bf16.msrb.mxu0 %v1964_v10  ;;  %v1981_v9 = vld [vmem:[#allocation11 + $0x78] sm:$0xff] }
  0x52   : > { %v1977_v10 = vld [vmem:[#allocation9 + $0x78] sm:$0xff] }
  0x53   : > { %570 = vmatpush.bf16.msra.mxu1 %v1950_v14  ;;  %2009 = vmatpush.bf16.msra.mxu2 %v1950_v14 }
  0x55   : > { %692 = vmatpush.bf16.msrb.mxu3 %v1959_v12  ;;  %748 = vmatpush.bf16.msrb.mxu0 %v1963_v13  ;;  %v1989_v13 = vld [vmem:[#allocation11 + $0x98] sm:$0xff] }
  0x57   : > { %814 = vmatpush.bf16.msrb.mxu1 %v1969_v17  ;;  %622 = vmatpush.bf16.msrb.mxu2 %v1957_v19  ;;  %v1980_v19 = vld [vmem:[#allocation11 + $0x70] sm:$0xff] }
  0x59   : > { %693 = vmatpush.bf16.msrb.mxu3 %v1958_v15  ;;  %749 = vmatpush.bf16.msrb.mxu0 %v1962_v16 }
  0x5b   : > { %815 = vmatpush.bf16.msrb.mxu1 %v1968_v18  ;;  %623 = vmatpush.bf16.msrb.mxu2 %v1956_v21  ;;  %v1984_v21 = vld [vmem:[#allocation9 + $0x90] sm:$0xff] }
  0x5d   : > { %1096 = vmatpush.bf16.msra.mxu0 %v1981_v9  ;;  %1040 = vmatpush.bf16.msra.mxu3 %v1977_v10 }
  0x5f   : > { %816 = vmatpush.bf16.msrb.mxu1 %v1967_v20  ;;  %624 = vmatpush.bf16.msrb.mxu2 %v1955_v26  ;;  %v1976_v20 = vld [vmem:[#allocation9 + $0x70] sm:$0xff] }
  0x61   : > { %1097 = vmatpush.bf16.msra.mxu0 %v1980_v19  ;;  %1041 = vmatpush.bf16.msra.mxu3 %v1976_v20 }
  0x63   : > { %817 = vmatpush.bf16.msrb.mxu1 %v1966_v23  ;;  %625 = vmatpush.bf16.msrb.mxu2 %v1954_v28  ;;  %v1975_v28 = vld [vmem:[#allocation9 + $0x68] sm:$0xff] }
  0x65   : > { %1042 = vmatpush.bf16.msra.mxu3 %v1975_v28 }
  0xc9   : > { %v488_v24 = vpop.f32.mrf.mxu0 }
  0xca   : > { %v2630_v25 = vadd.f32 %v2112_v22, %v488_v24  ;;  %v1988_v24 = vld [vmem:[#allocation11 + $0x90] sm:$0xff] }
  0xcc   : > { %507 = vst.msk [vmem:[#allocation2 + $0x8] sm:$0xff] %vm498_vm1, %v2630_v25 }
  0xcf   : > { %v493_v27 = vpop.f32.mrf.mxu3 }
  0xd0   : > { %v2634_v29 = vadd.f32 %v2112_v22, %v493_v27  ;;  %v1979_v27 = vld [vmem:[#allocation11 + $0x68] sm:$0xff] }
  0xd1   : > { %v490_v30 = vpop.f32.mrf.mxu0  ;;  %1098 = vmatpush.bf16.msra.mxu0 %v1979_v27 }
  0xd2   : > { %509 = vst.msk [vmem:[#allocation2 + $0x28] sm:$0xff] %vm498_vm1, %v2634_v29  ;;  %v2638_v31 = vadd.f32 %v2112_v22, %v490_v30  ;;  %v1983_v30 = vld [vmem:[#allocation9 + $0x88] sm:$0xff] }
  0xd3   : > { %v519_v34 = vld [vmem:[#allocation2 + $0x7] sm:$0xff] }
  0xd4   : > { %508 = vst.msk [vmem:[#allocation2 + $0x10] sm:$0xff] %vm498_vm1, %v2638_v31  ;;  %v641_v35 = vld [vmem:[#allocation2 + $0x8] sm:$0xff] }
  0xd7   : > { %v495_v32 = vpop.f32.mrf.mxu3 }
  0xd8   : > { %v2642_v33 = vadd.f32 %v2112_v22, %v495_v32  ;;  %v2670_v32 = vld [vmem:[%s2793_s4] ss:$0 sm:$0xff] }
  0xd9   : > { %v521_v40 = vld [vmem:[#allocation2 + $0x27] sm:$0xff] }
  0xda   : > { %510 = vst.msk [vmem:[#allocation2 + $0x30] sm:$0xff] %vm498_vm1, %v2642_v33  ;;  %v643_v49 = vld [vmem:[#allocation2 + $0x28] sm:$0xff] }
  0xdb   : > { %v520_v36 = vld [vmem:[#allocation2 + $0xf] sm:$0xff] }
  0xdc   : > { %v642_v37 = vld [vmem:[#allocation2 + $0x10] sm:$0xff]  ;;  %v523_v38 = vpack.c.bf16 %v520_v36, %v519_v34 }
  0xdd   : > { %v645_v39 = vpack.c.bf16 %v642_v37, %v641_v35  ;;  %v765_v45 = vld [vmem:[#allocation2 + $0x9] sm:$0xff]  ;;  %v766_v47 = vld [vmem:[#allocation2 + $0x11] sm:$0xff]  ;;  %v1987_v35 = vld [vmem:[#allocation11 + $0x88] sm:$0xff] }
  0xde   : > { %1710 = vmatmul.msk.bf16.vlgmr.msra.gmra.mxu1 %vm498_vm1, %v523_v38  ;;  %v769_v51 = vpack.c.bf16 %v766_v47, %v765_v45 }
  0xdf   : > { %1746 = vmatmul.msk.bf16.vlgmr.msrb.gmra.mxu3 %vm498_vm1, %v645_v39  ;;  %1764 = vmatmul.msk.bf16.vlgmr.msrb.gmra.mxu0 %vm498_vm1, %v645_v39 }
  0xe0   : > { %1164 = vmatpush.bf16.msra.mxu1 %v1985_v11 }
  0xe1   : > { %v522_v41 = vld [vmem:[#allocation2 + $0x2f] sm:$0xff] }
  0xe2   : > { %v524_v43 = vpack.c.bf16 %v522_v41, %v521_v40  ;;  %v644_v46 = vld [vmem:[#allocation2 + $0x30] sm:$0xff] }
  0xe3   : > { %v646_v50 = vpack.c.bf16 %v644_v46, %v643_v49  ;;  %v767_v53 = vld [vmem:[#allocation2 + $0x29] sm:$0xff]  ;;  %v768_v54 = vld [vmem:[#allocation2 + $0x31] sm:$0xff] }
  0xe4   : > { %1711 = vmatmul.msk.bf16.vlgmr.msra.gmra.mxu2 %vm498_vm1, %v524_v43  ;;  %v770_v55 = vpack.c.bf16 %v768_v54, %v767_v53  ;;  %1165 = vmatpush.bf16.msra.mxu1 %v1984_v21 }
  0xe5   : > { %870 = vmatpush.bf16.msra.mxu2 %v1973_v42  ;;  %v1978_v42 = vld [vmem:[#allocation11 + $0x60] sm:$0xff] }
  0xe6   : > { %1099 = vmatpush.bf16.msra.mxu0 %v1978_v42 }
  0xe8   : > { %1166 = vmatpush.bf16.msra.mxu1 %v1983_v30 }
  0xe9   : > { %871 = vmatpush.bf16.msra.mxu2 %v1972_v44  ;;  %v1982_v44 = vld [vmem:[#allocation9 + $0x80] sm:$0xff] }
  0xec   : > { %1167 = vmatpush.bf16.msra.mxu1 %v1982_v44  ;;  %v1992_v44 = vld [vmem:[#allocation9 + $0xb0] sm:$0xff] }
  0xed   : > { %872 = vmatpush.bf16.msra.mxu2 %v1971_v48  ;;  %v1986_v48 = vld [vmem:[#allocation11 + $0x80] sm:$0xff] }
  0xee   : > { %1782 = vmatmul.msk.bf16.vlgmr.msrb.gmra.mxu1 %vm498_vm1, %v769_v51 }
  0xef   : > { %1747 = vmatmul.msk.bf16.gmra.mxu3 %vm498_vm1, %v646_v50  ;;  %1765 = vmatmul.msk.bf16.gmra.mxu0 %vm498_vm1, %v646_v50 }
  0xf1   : > { %873 = vmatpush.bf16.msra.mxu2 %v1970_v52 }
  0xf4   : > { %1728 = vmatmul.msk.bf16.vlgmr.msrb.gmra.mxu2 %vm498_vm1, %v523_v38 }
  0xf5   : > { %1220 = vmatpush.bf16.msrb.mxu2 %v1989_v13  ;;  %v1996_v13 = vld [vmem:[#allocation11 + $0xb0] sm:$0xff] }
  0xf9   : > { %1221 = vmatpush.bf16.msrb.mxu2 %v1988_v24 }
  0xfd   : > { %1222 = vmatpush.bf16.msrb.mxu2 %v1987_v35 }
  0xfe   : > { %1783 = vmatmul.msk.bf16.gmra.mxu1 %vm498_vm1, %v770_v55 }
 0x101   : > { %1223 = vmatpush.bf16.msrb.mxu2 %v1986_v48 }
 0x104   : > { %1729 = vmatmul.msk.bf16.gmra.mxu2 %vm498_vm1, %v524_v43  ;;  %v1974_v43 = vld [vmem:[#allocation9 + $0x60] sm:$0xff] }
 0x105   : > { %1043 = vmatpush.bf16.msra.mxu3 %v1974_v43 }
 0x114   : > { %1800 = vmatmul.msk.bf16.vlgmr.msra.gmra.mxu2 %vm498_vm1, %v769_v51 }
 0x124   : > { %1801 = vmatmul.msk.bf16.gmra.mxu2 %vm498_vm1, %v770_v55 }
 0x15b   : > { %v572_v1 = vpop.f32.mrf.mxu1 }
 0x15c   : > { %v751_v62 = vpop.f32.mrf.mxu0  ;;  %v582_v46 = vadd.f32 %v2670_v32, %v572_v1 }
 0x162   : > { %v695_v36 = vpop.f32.mrf.mxu3 }
 0x163   : > { %v2665_v14 = vpop.f32.mrf.mxu1  ;;  %v705_v53 = vadd.f32 %v695_v36, %v582_v46 }
 0x164   : > { %v753_v5 = vpop.f32.mrf.mxu0  ;;  %v583_v10 = vadd.f32 %v2670_v32, %v2665_v14 }
 0x167   : > { %v2658_v56 = vpop.f32.mrf.mxu2 }
 0x16b   : > { %v819_v39 = vpop.f32.mrf.mxu1 }
 0x16c   : > { %v756_v22 = vpop.f32.mrf.mxu0 }
 0x16f   : > { %v2660_v57 = vpop.f32.mrf.mxu2 }
 0x174   : > { %v758_v50 = vpop.f32.mrf.mxu0 }
 0x177   : > { %v627_v58 = vpop.f32.mrf.mxu2 }
 0x178   : > { %v637_v0 = vadd.f32 %v2114_v61, %v627_v58 }
 0x17a   : > { %v761_v2 = vadd.f32 %v751_v62, %v637_v0  ;;  %v697_v62 = vpop.f32.mrf.mxu3 }
 0x17b   : > { %v706_v20 = vadd.f32 %v697_v62, %v583_v10 }
 0x17f   : > { %v629_v59 = vpop.f32.mrf.mxu2 }
 0x180   : > { %v638_v6 = vadd.f32 %v2114_v61, %v629_v59 }
 0x182   : > { %v762_v8 = vadd.f32 %v753_v5, %v638_v6  ;;  %v821_v5 = vpop.f32.mrf.mxu1 }
 0x183   : > { %v830_v27 = vadd.f32 %v821_v5, %v706_v20 }
 0x187   : > { %v632_v60 = vpop.f32.mrf.mxu2 }
 0x188   : > { %v639_v17 = vadd.f32 %v2114_v61, %v632_v60 }
 0x18a   : > { %v763_v26 = vadd.f32 %v756_v22, %v639_v17 }
 0x18f   : > { %v634_v63 = vpop.f32.mrf.mxu2 }
 0x190   : > { %v640_v40 = vadd.f32 %v2114_v61, %v634_v63 }
 0x192   : > { %v764_v52 = vadd.f32 %v758_v50, %v640_v40  ;;  %v1995_v40 = vld [vmem:[#allocation11 + $0xa8] sm:$0xff] }
 0x197   : > { %v875_v3 = vpop.f32.mrf.mxu2 }
 0x198   : > { %v885_v4 = vadd.f32 %v875_v3, %v761_v2  ;;  %v829_v2 = vadd.f32 %v819_v39, %v705_v53 }
 0x19a   : > { %v1802_v7 = vmul.f32 -1.442695, %v885_v4 }
 0x19c   : > { %2118 = vpow2.f32 %v1802_v7 }
 0x19f   : > { %v877_v12 = vpop.f32.mrf.mxu2 }
 0x1a0   : > { %v886_v15 = vadd.f32 %v877_v12, %v762_v8  ;;  %v1997_v8 = vld [vmem:[#allocation11 + $0xb8] sm:$0xff] }
 0x1a1   : > { %1344 = vmatpush.bf16.msrb.mxu0 %v1997_v8 }
 0x1a2   : > { %v2119_v16 = vpop.eup %2118  ;;  %v1803_v18 = vmul.f32 -1.442695, %v886_v15 }
 0x1a3   : > { %v901_v23 = vadd.f32 1.0, %v2119_v16 }
 0x1a4   : > { %2120 = vpow2.f32 %v1803_v18 }
 0x1a5   : > { %2122 = vrcp.f32 %v901_v23  ;;  %v916_v54 = vand.u32 2147483648, %v901_v23  ;;  %v914_v59 = vand.u32 2147483647, %v901_v23  ;;  %vm910_vm3 = vweird.f32 %v901_v23  ;;  %1345 = vmatpush.bf16.msrb.mxu0 %v1996_v13 }
 0x1a7   : > { %v880_v34 = vpop.f32.mrf.mxu2  ;;  %v917_v3 = vor.u32 1.1754944e-38, %v916_v54  ;;  %vm915_vm5 = vcmp.eq.f32.partialorder %v914_v59, 8.507059e+37  ;;  %v585_v59 = vadd.f32 %v2670_v32, %v2660_v57 }
 0x1a8   : > { %v887_v37 = vadd.f32 %v880_v34, %v763_v26  ;;  %v700_v26 = vpop.f32.mrf.mxu3  ;;  %v824_v34 = vpop.f32.mrf.mxu1 }
 0x1a9   : > { %1346 = vmatpush.bf16.msrb.mxu0 %v1995_v40 }
 0x1aa   : > { %v2121_v38 = vpop.eup %2120  ;;  %v1804_v41 = vmul.f32 -1.442695, %v887_v37  ;;  %v1993_v37 = vld [vmem:[#allocation9 + $0xb8] sm:$0xff] }
 0x1ab   : > { %v2123_v45 = vpop.eup %2122  ;;  %v902_v47 = vadd.f32 1.0, %v2121_v38  ;;  %v584_v38 = vadd.f32 %v2670_v32, %v2658_v56  ;;  %1288 = vmatpush.bf16.msrb.mxu3 %v1993_v37 }
 0x1ac   : > { %v906_v49 = vmul.f32 %v2123_v45, %v901_v23  ;;  %2124 = vpow2.f32 %v1804_v41  ;;  %vm911_vm2 = vweird.f32 %v2123_v45 }
 0x1ad   : > { %2126 = vrcp.f32 %v902_v47  ;;  %vm912_vm4 = vmor %vm910_vm3, %vm911_vm2  ;;  %v931_v15 = vand.u32 2147483648, %v902_v47  ;;  %v929_v18 = vand.u32 2147483647, %v902_v47  ;;  %vm925_vm7 = vweird.f32 %v902_v47 }
 0x1ae   : > { %v907_v51 = vsub.f32 1.0, %v906_v49  ;;  %v707_v46 = vadd.f32 %v700_v26, %v584_v38  ;;  %v2115_v38 = vld [vmem:[%s2795_s6 + $0x1] ss:$0 sm:$0xff] }
 0x1af   : > { %v882_v55 = vpop.f32.mrf.mxu2  ;;  %v932_v14 = vor.u32 1.1754944e-38, %v931_v15  ;;  %vm930_vm9 = vcmp.eq.f32.partialorder %v929_v18, 8.507059e+37  ;;  %1289 = vmatpush.bf16.msrb.mxu3 %v1992_v44 }
 0x1b0   : > { %v908_v58 = vmul.f32 %v2123_v45, %v907_v51  ;;  %v888_v60 = vadd.f32 %v882_v55, %v764_v52  ;;  %v831_v50 = vadd.f32 %v824_v34, %v707_v46  ;;  %v1991_v52 = vld [vmem:[#allocation9 + $0xa8] sm:$0xff]  ;;  %v702_v54 = vpop.f32.mrf.mxu3 }
 0x1b2   : > { %v2125_v61 = vpop.eup %2124  ;;  %v909_v63 = vadd.f32 %v2123_v45, %v908_v58  ;;  %v1805_v0 = vmul.f32 -1.442695, %v888_v60 }
 0x1b3   : > { %v2127_v1 = vpop.eup %2126  ;;  %v2673_v4 = vadd.f32 1.0, %v2125_v61  ;;  %v826_v61 = vpop.f32.mrf.mxu1  ;;  %1290 = vmatpush.bf16.msrb.mxu3 %v1991_v52 }
 0x1b4   : > { %v913_v6 = vsel %vm912_vm4, %v2123_v45, %v909_v63  ;;  %v921_v7 = vmul.f32 %v2127_v1, %v902_v47  ;;  %2128 = vpow2.f32 %v1805_v0  ;;  %vm926_vm6 = vweird.f32 %v2127_v1  ;;  %v1994_v45 = vld [vmem:[#allocation11 + $0xa0] sm:$0xff] }
 0x1b5   : > { %v918_v9 = vsel %vm915_vm5, %v917_v3, %v913_v6  ;;  %2130 = vrcp.f32 %v2673_v4  ;;  %vm927_vm8 = vmor %vm925_vm7, %vm926_vm6  ;;  %v946_v39 = vand.u32 2147483648, %v2673_v4  ;;  %v944_v43 = vand.u32 2147483647, %v2673_v4  ;;  %1347 = vmatpush.bf16.msrb.mxu0 %v1994_v45 }
 0x1b6   : > { %v965_v11 = vmul.f32 %v918_v9, %v829_v2  ;;  %v922_v12 = vsub.f32 1.0, %v921_v7  ;;  %vm940_vm11 = vweird.f32 %v2673_v4  ;;  %v708_v2 = vadd.f32 %v702_v54, %v585_v59 }
 0x1b7   : > { %v947_v49 = vor.u32 1.1754944e-38, %v946_v39  ;;  %vm945_vm13 = vcmp.eq.f32.partialorder %v944_v43, 8.507059e+37 }
 0x1b8   : > { %v969_v16 = vadd.f32 %v965_v11, %v2630_v25  ;;  %v923_v17 = vmul.f32 %v2127_v1, %v922_v12  ;;  %v832_v57 = vadd.f32 %v826_v61, %v708_v2 }
 0x1ba   : > { %v2129_v19 = vpop.eup %2128  ;;  %v2679_v21 = vmul.f32 0.70710677, %v969_v16  ;;  %v924_v22 = vadd.f32 %v2127_v1, %v923_v17 }
 0x1bb   : > { %v2131_v23 = vpop.eup %2130  ;;  %v2681_v24 = vadd.f32 1.0, %v2129_v19 }
 0x1bc   : > { %977 = vst.msk [vmem:[#allocation2 + $0x8] sm:$0xff] %vm498_vm1, %v2679_v21  ;;  %v928_v25 = vsel %vm927_vm8, %v2127_v1, %v924_v22  ;;  %v936_v28 = vmul.f32 %v2131_v23, %v2673_v4  ;;  %vm941_vm10 = vweird.f32 %v2131_v23  ;;  %v1990_v1 = vld [vmem:[#allocation9 + $0xa0] sm:$0xff] }
 0x1bd   : > { %v933_v30 = vsel %vm930_vm9, %v932_v14, %v928_v25  ;;  %2132 = vrcp.f32 %v2681_v24  ;;  %vm942_vm12 = vmor %vm940_vm11, %vm941_vm10  ;;  %v961_v60 = vand.u32 2147483648, %v2681_v24  ;;  %v959_v0 = vand.u32 2147483647, %v2681_v24  ;;  %1291 = vmatpush.bf16.msrb.mxu3 %v1990_v1 }
 0x1be   : > { %v966_v35 = vmul.f32 %v933_v30, %v830_v27  ;;  %v937_v36 = vsub.f32 1.0, %v936_v28  ;;  %vm955_vm15 = vweird.f32 %v2681_v24 }
 0x1bf   : > { %v962_v32 = vor.u32 1.1754944e-38, %v961_v60  ;;  %vm960_vm2 = vcmp.eq.f32.partialorder %v959_v0, 8.507059e+37 }
 0x1c0   : > { %v970_v41 = vadd.f32 %v966_v35, %v2638_v31  ;;  %v938_v42 = vmul.f32 %v2131_v23, %v937_v36 }
 0x1c2   : > { %v2692_v47 = vmul.f32 0.70710677, %v970_v41  ;;  %v939_v48 = vadd.f32 %v2131_v23, %v938_v42  ;;  %v2001_v42 = vld [vmem:[#allocation12 + $0x18] sm:$0xff] }
 0x1c3   : > { %v2133_v56 = vpop.eup %2132  ;;  %v991_v5 = vld [vmem:[#allocation2 + $0x7] sm:$0xff]  ;;  %1499 = vmatpush.bf16.msrb.mxu1 %v2001_v42 }
 0x1c4   : > { %978 = vst.msk [vmem:[#allocation2 + $0x10] sm:$0xff] %vm498_vm1, %v2692_v47  ;;  %v943_v31 = vsel %vm942_vm12, %v2131_v23, %v939_v48  ;;  %v951_v51 = vmul.f32 %v2133_v56, %v2681_v24  ;;  %vm956_vm14 = vweird.f32 %v2133_v56  ;;  %v1115_v6 = vld [vmem:[#allocation2 + $0x8] sm:$0xff] }
 0x1c5   : > { %v948_v53 = vsel %vm945_vm13, %v947_v49, %v943_v31  ;;  %vm957_vm0 = vmor %vm955_vm15, %vm956_vm14  ;;  %v2000_v48 = vld [vmem:[#allocation12 + $0x10] sm:$0xff] }
 0x1c6   : > { %v967_v55 = vmul.f32 %v948_v53, %v831_v50  ;;  %v952_v58 = vsub.f32 1.0, %v951_v51  ;;  %v1999_v50 = vld [vmem:[#allocation12 + $0x8] sm:$0xff] }
 0x1c7   : > { %1500 = vmatpush.bf16.msrb.mxu1 %v2000_v48 }
 0x1c8   : > { %v971_v62 = vadd.f32 %v967_v55, %v2634_v29  ;;  %v953_v63 = vmul.f32 %v2133_v56, %v952_v58  ;;  %v1998_v58 = vld [vmem:[#allocation12] sm:$0xff] }
 0x1ca   : > { %v2703_v3 = vmul.f32 0.70710677, %v971_v62  ;;  %v954_v4 = vadd.f32 %v2133_v56, %v953_v63 }
 0x1cb   : > { %v992_v7 = vld [vmem:[#allocation2 + $0xf] sm:$0xff]  ;;  %1501 = vmatpush.bf16.msrb.mxu1 %v1999_v50 }
 0x1cc   : > { %v1116_v8 = vld [vmem:[#allocation2 + $0x10] sm:$0xff]  ;;  %979 = vst.msk [vmem:[#allocation2 + $0x28] sm:$0xff] %vm498_vm1, %v2703_v3  ;;  %v958_v29 = vsel %vm957_vm0, %v2133_v56, %v954_v4  ;;  %v995_v9 = vpack.c.bf16 %v992_v7, %v991_v5 }
 0x1cd   : > { %v1119_v10 = vpack.c.bf16 %v1116_v8, %v1115_v6  ;;  %v963_v11 = vsel %vm960_vm2, %v962_v32, %v958_v29  ;;  %v1240_v23 = vld [vmem:[#allocation2 + $0x11] sm:$0xff]  ;;  %v2737_v8 = vld [vmem:[%s2793_s4 + $0x1] ss:$0 sm:$0xff] }
 0x1ce   : > { %v968_v12 = vmul.f32 %v963_v11, %v832_v57  ;;  %1824 = vmatmul.msk.bf16.vlgmr.msra.gmra.mxu3 %vm498_vm1, %v995_v9  ;;  %1842 = vmatmul.msk.bf16.vlgmr.msra.gmra.mxu0 %vm498_vm1, %v995_v9 }
 0x1cf   : > { %1860 = vmatmul.msk.bf16.vlgmr.msra.gmra.mxu1 %vm498_vm1, %v1119_v10  ;;  %1878 = vmatmul.msk.bf16.vlgmr.msrb.gmra.mxu2 %vm498_vm1, %v1119_v10 }
 0x1d0   : > { %v972_v13 = vadd.f32 %v968_v12, %v2642_v33  ;;  %v1239_v33 = vld [vmem:[#allocation2 + $0x9] sm:$0xff]  ;;  %1502 = vmatpush.bf16.msrb.mxu1 %v1998_v58 }
 0x1d1   : > { %v1243_v14 = vpack.c.bf16 %v1240_v23, %v1239_v33 }
 0x1d2   : > { %v2713_v15 = vmul.f32 0.70710677, %v972_v13 }
 0x1d3   : > { %v993_v16 = vld [vmem:[#allocation2 + $0x27] sm:$0xff] }
 0x1d4   : > { %980 = vst.msk [vmem:[#allocation2 + $0x30] sm:$0xff] %vm498_vm1, %v2713_v15  ;;  %v1117_v18 = vld [vmem:[#allocation2 + $0x28] sm:$0xff] }
 0x1db   : > { %v994_v17 = vld [vmem:[#allocation2 + $0x2f] sm:$0xff] }
 0x1dc   : > { %v1118_v19 = vld [vmem:[#allocation2 + $0x30] sm:$0xff]  ;;  %v996_v20 = vpack.c.bf16 %v994_v17, %v993_v16 }
 0x1dd   : > { %v1120_v22 = vpack.c.bf16 %v1118_v19, %v1117_v18  ;;  %v1241_v24 = vld [vmem:[#allocation2 + $0x29] sm:$0xff]  ;;  %v1242_v26 = vld [vmem:[#allocation2 + $0x31] sm:$0xff] }
 0x1de   : > { %1825 = vmatmul.msk.bf16.gmra.mxu3 %vm498_vm1, %v996_v20  ;;  %1843 = vmatmul.msk.bf16.gmra.mxu0 %vm498_vm1, %v996_v20  ;;  %v1244_v27 = vpack.c.bf16 %v1242_v26, %v1241_v24 }
 0x1df   : > { %1861 = vmatmul.msk.bf16.gmra.mxu1 %vm498_vm1, %v1120_v22  ;;  %1879 = vmatmul.msk.bf16.gmra.mxu2 %vm498_vm1, %v1120_v22 }
 0x1ee   : > { %1896 = vmatmul.msk.bf16.vlgmr.msrb.gmra.mxu3 %vm498_vm1, %v1243_v14  ;;  %1914 = vmatmul.msk.bf16.vlgmr.msrb.gmra.mxu0 %vm498_vm1, %v1243_v14 }
 0x1fe   : > { %1897 = vmatmul.msk.bf16.gmra.mxu3 %vm498_vm1, %v1244_v27  ;;  %1915 = vmatmul.msk.bf16.gmra.mxu0 %vm498_vm1, %v1244_v27 }
 0x24b   : > { %v1101_v25 = vpop.f32.mrf.mxu0 }
 0x24c   : > { %v1111_v39 = vadd.f32 %v2115_v38, %v1101_v25  ;;  %v1169_v1 = vpop.f32.mrf.mxu1 }
 0x251   : > { %v1045_v30 = vpop.f32.mrf.mxu3 }
 0x252   : > { %v1225_v35 = vpop.f32.mrf.mxu2  ;;  %v1055_v13 = vadd.f32 %v2737_v8, %v1045_v30 }
 0x253   : > { %v1103_v28 = vpop.f32.mrf.mxu0  ;;  %v1235_v40 = vadd.f32 %v1225_v35, %v1111_v39 }
 0x254   : > { %v1112_v56 = vadd.f32 %v2115_v38, %v1103_v28  ;;  %v1171_v24 = vpop.f32.mrf.mxu1  ;;  %v1179_v28 = vadd.f32 %v1169_v1, %v1055_v13 }
 0x259   : > { %v2725_v36 = vpop.f32.mrf.mxu3 }
 0x25a   : > { %v1227_v41 = vpop.f32.mrf.mxu2  ;;  %v1056_v25 = vadd.f32 %v2737_v8, %v2725_v36 }
 0x25b   : > { %v1106_v34 = vpop.f32.mrf.mxu0  ;;  %v1236_v49 = vadd.f32 %v1227_v41, %v1112_v56 }
 0x25c   : > { %v1113_v60 = vadd.f32 %v2115_v38, %v1106_v34  ;;  %v1180_v42 = vadd.f32 %v1171_v24, %v1056_v25 }
 0x261   : > { %v2730_v43 = vpop.f32.mrf.mxu3 }
 0x262   : > { %v1230_v52 = vpop.f32.mrf.mxu2 }
 0x263   : > { %v1108_v37 = vpop.f32.mrf.mxu0  ;;  %v1237_v61 = vadd.f32 %v1230_v52, %v1113_v60  ;;  %v1057_v60 = vadd.f32 %v2737_v8, %v2730_v43 }
 0x264   : > { %v1114_v32 = vadd.f32 %v2115_v38, %v1108_v37 }
 0x269   : > { %v2732_v53 = vpop.f32.mrf.mxu3 }
 0x26a   : > { %v1232_v5 = vpop.f32.mrf.mxu2 }
 0x26b   : > { %v1349_v44 = vpop.f32.mrf.mxu0  ;;  %v1238_v29 = vadd.f32 %v1232_v5, %v1114_v32 }
 0x26c   : > { %v1359_v45 = vadd.f32 %v1349_v44, %v1235_v40 }
 0x26e   : > { %v1916_v46 = vmul.f32 -1.442695, %v1359_v45 }
 0x270   : > { %2134 = vpow2.f32 %v1916_v46 }
 0x271   : > { %v1293_v6 = vpop.f32.mrf.mxu3 }
 0x272   : > { %v1303_v37 = vadd.f32 %v1293_v6, %v1179_v28 }
 0x273   : > { %v1351_v31 = vpop.f32.mrf.mxu0 }
 0x274   : > { %v1360_v51 = vadd.f32 %v1351_v31, %v1236_v49 }
 0x276   : > { %v2135_v54 = vpop.eup %2134  ;;  %v1917_v55 = vmul.f32 -1.442695, %v1360_v51 }
 0x277   : > { %v1375_v59 = vadd.f32 1.0, %v2135_v54  ;;  %v1174_v54 = vpop.f32.mrf.mxu1 }
 0x278   : > { %2136 = vpow2.f32 %v1917_v55 }
 0x279   : > { %2138 = vrcp.f32 %v1375_v59  ;;  %v1390_v16 = vand.u32 2147483648, %v1375_v59  ;;  %vm1384_vm4 = vweird.f32 %v1375_v59  ;;  %v1388_v19 = vand.u32 2147483647, %v1375_v59  ;;  %v1295_v27 = vpop.f32.mrf.mxu3 }
 0x27a   : > { %v1304_v56 = vadd.f32 %v1295_v27, %v1180_v42 }
 0x27b   : > { %v1354_v62 = vpop.f32.mrf.mxu0  ;;  %v1391_v26 = vor.u32 1.1754944e-38, %v1390_v16  ;;  %vm1389_vm6 = vcmp.eq.f32.partialorder %v1388_v19, 8.507059e+37 }
 0x27c   : > { %v1361_v63 = vadd.f32 %v1354_v62, %v1237_v61 }
 0x27e   : > { %v2137_v0 = vpop.eup %2136  ;;  %v1918_v2 = vmul.f32 -1.442695, %v1361_v63 }
 0x27f   : > { %v2139_v4 = vpop.eup %2138  ;;  %v1376_v57 = vadd.f32 1.0, %v2137_v0 }
 0x280   : > { %v1380_v7 = vmul.f32 %v2139_v4, %v1375_v59  ;;  %2140 = vpow2.f32 %v1918_v2  ;;  %vm1385_vm3 = vweird.f32 %v2139_v4 }
 0x281   : > { %2142 = vrcp.f32 %v1376_v57  ;;  %vm1386_vm5 = vmor %vm1384_vm4, %vm1385_vm3  ;;  %v1405_v35 = vand.u32 2147483648, %v1376_v57  ;;  %v1403_v39 = vand.u32 2147483647, %v1376_v57  ;;  %vm1399_vm8 = vweird.f32 %v1376_v57  ;;  %v1298_v55 = vpop.f32.mrf.mxu3 }
 0x282   : > { %v1381_v9 = vsub.f32 1.0, %v1380_v7 }
 0x283   : > { %v1356_v10 = vpop.f32.mrf.mxu0  ;;  %v1406_v46 = vor.u32 1.1754944e-38, %v1405_v35  ;;  %vm1404_vm10 = vcmp.eq.f32.partialorder %v1403_v39, 8.507059e+37 }
 0x284   : > { %v1382_v11 = vmul.f32 %v2139_v4, %v1381_v9  ;;  %v1362_v12 = vadd.f32 %v1356_v10, %v1238_v29 }
 0x286   : > { %v2141_v17 = vpop.eup %2140  ;;  %v1383_v18 = vadd.f32 %v2139_v4, %v1382_v11  ;;  %v1919_v20 = vmul.f32 -1.442695, %v1362_v12  ;;  %v1176_v11 = vpop.f32.mrf.mxu1 }
 0x287   : > { %v2143_v22 = vpop.eup %2142  ;;  %v1377_v33 = vadd.f32 1.0, %v2141_v17 }
 0x288   : > { %v1387_v23 = vsel %vm1386_vm5, %v2139_v4, %v1383_v18  ;;  %v1395_v14 = vmul.f32 %v2143_v22, %v1376_v57  ;;  %2144 = vpow2.f32 %v1919_v20  ;;  %vm1400_vm7 = vweird.f32 %v2143_v22 }
 0x289   : > { %2146 = vrcp.f32 %v1377_v33  ;;  %v1392_v34 = vsel %vm1389_vm6, %v1391_v26, %v1387_v23  ;;  %vm1401_vm9 = vmor %vm1399_vm8, %vm1400_vm7  ;;  %vm1414_vm12 = vweird.f32 %v1377_v33  ;;  %v1420_v61 = vand.u32 2147483648, %v1377_v33  ;;  %v1300_v12 = vpop.f32.mrf.mxu3  ;;  %v2117_v26 = vld [vmem:[%s2797_s8] ss:$0 sm:$0xff] }
 0x28a   : > { %v1396_v30 = vsub.f32 1.0, %v1395_v14  ;;  %v1439_v41 = vmul.f32 %v1392_v34, %v1303_v37  ;;  %v1418_v1 = vand.u32 2147483647, %v1377_v33  ;;  %v1181_v57 = vadd.f32 %v1174_v54, %v1057_v60 }
 0x28b   : > { %v1421_v6 = vor.u32 1.1754944e-38, %v1420_v61 }
 0x28c   : > { %v1397_v38 = vmul.f32 %v2143_v22, %v1396_v30  ;;  %v1443_v31 = vadd.f32 %v1439_v41, %v2679_v21  ;;  %vm1419_vm14 = vcmp.eq.f32.partialorder %v1418_v1, 8.507059e+37  ;;  %v1305_v29 = vadd.f32 %v1298_v55, %v1181_v57 }
 0x28e   : > { %v2145_v40 = vpop.eup %2144  ;;  %v1398_v44 = vadd.f32 %v2143_v22, %v1397_v38  ;;  %v1447_v62 = vmul.f32 0.70710677, %v1443_v31 }
 0x28f   : > { %v2147_v45 = vpop.eup %2146  ;;  %v1378_v48 = vadd.f32 1.0, %v2145_v40 }
 0x290   : > { %v1402_v36 = vsel %vm1401_vm9, %v2143_v22, %v1398_v44  ;;  %v1410_v49 = vmul.f32 %v2147_v45, %v1377_v33  ;;  %vm1415_vm11 = vweird.f32 %v2147_v45 }
 0x291   : > { %v1407_v50 = vsel %vm1404_vm10, %v1406_v46, %v1402_v36  ;;  %2148 = vrcp.f32 %v1378_v48  ;;  %vm1416_vm13 = vmor %vm1414_vm12, %vm1415_vm11  ;;  %v1435_v7 = vand.u32 2147483648, %v1378_v48  ;;  %v1433_v10 = vand.u32 2147483647, %v1378_v48 }
 0x292   : > { %v1440_v51 = vmul.f32 %v1407_v50, %v1304_v56  ;;  %v1411_v52 = vsub.f32 1.0, %v1410_v49  ;;  %vm1429_vm0 = vweird.f32 %v1378_v48 }
 0x293   : > { %vm1434_vm3 = vcmp.eq.f32.partialorder %v1433_v10, 8.507059e+37 }
 0x294   : > { %v1444_v58 = vadd.f32 %v1440_v51, %v2692_v47  ;;  %v1412_v59 = vmul.f32 %v2147_v45, %v1411_v52  ;;  %v1058_v47 = vadd.f32 %v2737_v8, %v2732_v53  ;;  %v1436_v53 = vor.u32 1.1754944e-38, %v1435_v7 }
 0x296   : > { %v1448_v63 = vmul.f32 0.70710677, %v1444_v58  ;;  %v1413_v0 = vadd.f32 %v2147_v45, %v1412_v59  ;;  %v1182_v16 = vadd.f32 %v1176_v11, %v1058_v47 }
 0x297   : > { %v2149_v2 = vpop.eup %2148 }
 0x298   : > { %v1451_v21 = vpack.c.bf16 %v1448_v63, %v1447_v62  ;;  %v1417_v4 = vsel %vm1416_vm13, %v2147_v45, %v1413_v0  ;;  %v1425_v5 = vmul.f32 %v2149_v2, %v1378_v48  ;;  %vm1430_vm15 = vweird.f32 %v2149_v2 }
 0x299   : > { %v1422_v43 = vsel %vm1419_vm14, %v1421_v6, %v1417_v4  ;;  %vm1431_vm2 = vmor %vm1429_vm0, %vm1430_vm15  ;;  %v1306_v8 = vadd.f32 %v1300_v12, %v1182_v16 }
 0x29a   : > { %v1426_v32 = vsub.f32 1.0, %v1425_v5  ;;  %1936 = vmatmul.msk.bf16.vlgmr.msrb.gmra.mxu1 %vm498_vm1, %v1451_v21  ;;  %v1441_v13 = vmul.f32 %v1422_v43, %v1305_v29 }
 0x29c   : > { %v1427_v9 = vmul.f32 %v2149_v2, %v1426_v32  ;;  %v1445_v20 = vadd.f32 %v1441_v13, %v2703_v3 }
 0x29e   : > { %v1428_v17 = vadd.f32 %v2149_v2, %v1427_v9  ;;  %v1449_v23 = vmul.f32 0.70710677, %v1445_v20 }
 0x2a0   : > { %v1432_v18 = vsel %vm1431_vm2, %v2149_v2, %v1428_v17 }
 0x2a1   : > { %v1437_v19 = vsel %vm1434_vm3, %v1436_v53, %v1432_v18 }
 0x2a2   : > { %v1442_v22 = vmul.f32 %v1437_v19, %v1306_v8 }
 0x2a4   : > { %v1446_v33 = vadd.f32 %v1442_v22, %v2713_v15 }
 0x2a6   : > { %v1450_v14 = vmul.f32 0.70710677, %v1446_v33 }
 0x2a8   : > { %v1452_v24 = vpack.c.bf16 %v1450_v14, %v1449_v23 }
 0x2aa   : > { %1937 = vmatmul.msk.bf16.gmra.mxu1 %vm498_vm1, %v1452_v24 }
 0x317   : > { %v1504_v27 = vpop.f32.mrf.mxu1 }
 0x318   : > { %v1505_v25 = vadd.f32 %v2117_v26, %v1504_v27 }
 0x31a   : > { %1514 = vst [vmem:[%s434_s2] sm:$0xff] %v1505_v25 }
 0x31f   : > { %v1506_v3 = vpop.f32.mrf.mxu1 }
 0x320   : > { %v1507_v28 = vadd.f32 %v2117_v26, %v1506_v3 }
 0x322   : > { %1515 = vst [vmem:[%s434_s2 + $0x8] sm:$0xff] %v1507_v28 }
 0x327   : > { %v1509_v15 = vpop.f32.mrf.mxu1 }
 0x328   : > { %v1510_v30 = vadd.f32 %v2117_v26, %v1509_v15 }
 0x32a   : > { %1516 = vst [vmem:[%s434_s2 + $0x10] sm:$0xff] %v1510_v30 }
 0x32f   : > { %v1511_v34 = vpop.f32.mrf.mxu1 }
 0x330   : > { %v1512_v35 = vadd.f32 %v2117_v26, %v1511_v34 }
 0x332   : > { %1517 = vst [vmem:[%s434_s2 + $0x18] sm:$0xff] %v1512_v35 }
 0x333   : > { %2357 = shalt.err (!%p2354_p9)
}
 0x334   : > { %s2418_s27 = smov 128   ;;  %s2419_s2 = smov 8  }
 0x335   : > { %2032 = dma.vmem_to_hbm [thread:$0]  (%p2568_p13), %s1533_s13, 512, %s1535_s23, %s1519_s24, %s2418_s27, %s2418_s27, %s2419_s2  }
 0x336 PF: > { %s1549_s3 = sand.u32 1, %s2396_s30   ;;  %p2815_p10 = scmp.ge.s32.totalorder %s2408_s12, 2 }
 0x337   : > { %s1550_s26 = scalar_lea.sflag [#allocation5], %s1549_s3 }
 0x338   : > { %p2055_p11 = pnand %p2815_p10, %p2573_p4 }
 0x33a   : > { %p2056_p0 = pneg %p2055_p11 }
 0x33c   : > { %2391 = dma.done.wait (%p2056_p0), %s1550_s26, 512  }
 0x33d   : > { %2393 = vsyncadd (%p2056_p0), %s1550_s26, 4294966784  ;;  %p25_p2 = scmp.ge.s32.totalorder %s2548_s18, 4   ;;  %s2816_s30 = smov %s2400_s10 }
 0x33e   : > { %s2817_s10 = smov %s2404_s11  ;;  %s2818_s11 = smov %s2560_s20 }
 0x33f   : > { %s2819_s12 = smov %s2548_s18  ;;  %27 = sbr.rel (!%p25_p2) target bundleno = 12 (0xc), region = 133 }
 0x344   :  { %1556 = vsyncpa [#allocation4], 1 }
 0x345   :  { %1558 = vsyncpa [#allocation4 + $0x1], 1 }
 0x346   :  { %1559 = vsyncpa [#allocation7], 1 }
 0x347   :  { %1560 = vsyncpa [#allocation10], 1 }
 0x348   :  { %1561 = vsyncpa [#allocation13], 1 }
 0x349   :  { %1562 = vsyncpa [#allocation5], 1 }
 0x34a   :  { %1564 = vsyncpa [#allocation5 + $0x1], 1 }

</bundles_post_ra>
